<compile_context>
chip_gen: v7x
topology: tpu7x:2x2x1
jax: 0.10.0
libtpu: 0.0.40
codegen_flags: <defaults>
</compile_context>

<pallas_src>
import functools
import math

import jax
import jax.numpy as jnp
from jax.experimental import pallas as pl
from jax.experimental.pallas import tpu as pltpu

EPS = 1e-5  # torch InstanceNorm2d default eps


# ------------------------------------------------------------------ kernel

def _block_in_kernel(xp_ref, w_ref, o_ref, acc_ref, *, k_h, k_w, stride,
                     out_h, out_w):
    """Fused ReflectionPad-Conv + InstanceNorm + ReLU for one sample.

    xp_ref : (Hp, Wp, Cin)        reflection-padded sample (channels-last)
    w_ref  : (k_h*k_w, Cin, Cout) per-tap conv weights
    o_ref  : (out_h*out_w, Cout)  output
    acc_ref: (out_h*out_w, Cout)  fp32 VMEM accumulator scratch
    """
    hw = out_h * out_w

    # fp32 accumulator, reset every sample (scratch persists across the grid).
    acc_ref[...] = jnp.zeros_like(acc_ref)

    # Conv as k_h*k_w accumulated MXU matmuls.  Statically unrolled: all
    # window offsets are compile-time constants, so no im2col buffer and no
    # dynamic-offset loads; the LLO scheduler can pipeline the matmuls.
    for t in range(k_h * k_w):
        dh, dw = divmod(t, k_w)
        if stride == 1:
            win = xp_ref[pl.ds(dh, out_h), pl.ds(dw, out_w), :]
        else:
            win = xp_ref[pl.ds(dh, out_h, stride=stride),
                         pl.ds(dw, out_w, stride=stride), :]
        slab = win.reshape(hw, win.shape[-1])                  # (HW, Cin)
        acc_ref[...] += jnp.dot(slab, w_ref[t],
                                preferred_element_type=jnp.float32)

    # InstanceNorm2d(affine=False, biased variance) + ReLU, fp32 math.
    # The conv bias is intentionally NOT added: a per-channel constant is
    # cancelled exactly by the mean subtraction below.
    y = acc_ref[...]
    mean = jnp.mean(y, axis=0, keepdims=True)
    var = jnp.mean(jnp.square(y - mean), axis=0, keepdims=True)
    y = (y - mean) * jax.lax.rsqrt(var + EPS)
    o_ref[...] = jnp.maximum(y, 0.0).astype(o_ref.dtype)


# ------------------------------------------------------------------ wrapper

def _padded_tile_bytes(shape, dtype):
    """Conservative VMEM footprint of a block (last dim -> 128 lanes,
    second-to-last -> 8 sublanes)."""
    rest = math.prod(shape[:-2])
    sl = -(-shape[-2] // 8) * 8
    ln = -(-shape[-1] // 128) * 128
    return rest * sl * ln * jnp.dtype(dtype).itemsize


def block_in_forward(x_nchw, weight, bias=None, *, stride=1, compute_dtype=None):
    """Block_IN forward.  x_nchw: (N, Cin, H, W), weight: (Cout, Cin, K, K)
    (PyTorch OIHW), bias accepted for API parity but mathematically cancelled
    by the following InstanceNorm, so it is unused.  Returns (N, Cout, Ho, Wo)."""
    del bias  # cancelled exactly by InstanceNorm's per-channel mean subtraction
    n, cin, h, w = x_nchw.shape
    cout, cin_w, k_h, k_w = weight.shape
    assert cin == cin_w
    pad = k_h // 2
    out_h = (h + 2 * pad - k_h) // stride + 1
    out_w = (w + 2 * pad - k_w) // stride + 1
    hw = out_h * out_w
    hp, wp = h + 2 * pad, w + 2 * pad

    cdt = compute_dtype or x_nchw.dtype   # e.g. pass jnp.bfloat16 for bf16 matmuls
    out_dtype = x_nchw.dtype

    # NCHW -> NHWC (+ reflection pad, cheap XLA op) so channels sit on lanes.
    x = jnp.transpose(x_nchw, (0, 2, 3, 1)).astype(cdt)
    xp = jnp.pad(x, ((0, 0), (pad, pad), (pad, pad), (0, 0)), mode="reflect")

    # OIHW -> (KH*KW, Cin, Cout): one (Cin, Cout) MXU operand per tap.
    w_taps = jnp.transpose(weight, (2, 3, 1, 0)).reshape(k_h * k_w, cin, cout)
    w_taps = w_taps.astype(cdt)

    # VMEM budget: 12 MiB keeps headroom on v5e (16 MiB scoped default) and v7x
    # (64 MiB physical), accounting for BlockSpec double-buffering.
    est = (2 * _padded_tile_bytes((hp, wp, cin), cdt)        # padded input
           + 2 * _padded_tile_bytes((hw, cout), out_dtype)   # output
           + _padded_tile_bytes((hw, cout), jnp.float32)     # accumulator
           + _padded_tile_bytes((k_h * k_w, cin, cout), cdt))  # resident weights
    # TODO(synk): for large H*W, tile the spatial axis on a grid dim and use a
    # two-pass (sum / sum-of-squares) InstanceNorm instead of this single-slab path.
    assert est <= 12 * 1024 * 1024, f"per-sample working set {est} B too large"

    kernel = functools.partial(_block_in_kernel, k_h=k_h, k_w=k_w, stride=stride,
                               out_h=out_h, out_w=out_w)

    out = pl.pallas_call(
        kernel,
        out_shape=jax.ShapeDtypeStruct((n, hw, cout), out_dtype),
        grid=(n,),
        in_specs=[
            pl.BlockSpec((None, hp, wp, cin), lambda i: (i, 0, 0, 0)),
            pl.BlockSpec((k_h * k_w, cin, cout), lambda i: (0, 0, 0)),
        ],
        out_specs=pl.BlockSpec((None, hw, cout), lambda i: (i, 0, 0)),
        scratch_shapes=[pltpu.VMEM((hw, cout), jnp.float32)],
        compiler_params=pltpu.CompilerParams(
            dimension_semantics=("parallel",)),
    )(xp, w_taps)

    # (N, Ho*Wo, Cout) -> (N, Cout, Ho, Wo)
    return jnp.transpose(out.reshape(n, out_h, out_w, cout), (0, 3, 1, 2))


# ------------------------------------------------------------------ reference

def block_in_reference(x_nchw, weight, bias, stride):
    """Pure-JAX/XLA reference matching the PyTorch Block_IN forward (with bias)."""
    k = weight.shape[2]
    pad = k // 2
    xp = jnp.pad(x_nchw, ((0, 0), (0, 0), (pad, pad), (pad, pad)), mode="reflect")
    y = jax.lax.conv_general_dilated(
        xp, weight, window_strides=(stride, stride), padding="VALID",
        dimension_numbers=("NCHW", "OIHW", "NCHW"),
        precision=jax.lax.Precision.HIGHEST)
    y = y + bias[None, :, None, None]
    mean = jnp.mean(y, axis=(2, 3), keepdims=True)
    var = jnp.mean(jnp.square(y - mean), axis=(2, 3), keepdims=True)
    y = (y - mean) * jax.lax.rsqrt(var + EPS)
    return jnp.maximum(y, 0.0)


def init_block_in_params(key, in_c, out_c, kernel_size):
    wkey, bkey = jax.random.split(key)
    fan_in = in_c * kernel_size * kernel_size
    fan_out = out_c * kernel_size * kernel_size
    std = math.sqrt(2.0 / (fan_in + fan_out))              # nn.init.xavier_normal_
    weight = std * jax.random.normal(
        wkey, (out_c, in_c, kernel_size, kernel_size), jnp.float32)
    bound = 1.0 / math.sqrt(fan_in)                        # torch Conv2d default bias init
    bias = jax.random.uniform(bkey, (out_c,), jnp.float32, -bound, bound)
    return weight, bias


# ------------------------------------------------------------------------ main

if __name__ == "__main__":
    key = jax.random.PRNGKey(0)
    pkey, xkey = jax.random.split(key)

    batch, in_c, out_c = 2, 4, 128
    height = width = 16
    kernel_size, stride = 3, 1

    weight, bias = init_block_in_params(pkey, in_c, out_c, kernel_size)
    x = jax.random.normal(xkey, (batch, in_c, height, width), jnp.float32)

    fwd = jax.jit(functools.partial(block_in_forward, stride=stride))
    out = jax.block_until_ready(fwd(x, weight, bias))

    pad = kernel_size // 2
    exp_h = (height + 2 * pad - kernel_size) // stride + 1
    exp_w = (width + 2 * pad - kernel_size) // stride + 1
    assert out.shape == (batch, out_c, exp_h, exp_w), out.shape
    assert bool(jnp.all(jnp.isfinite(out)))

    ref = block_in_reference(x, weight, bias, stride)
    max_err = float(jnp.max(jnp.abs(out - ref)))
    assert max_err < 2e-2, f"mismatch vs reference: {max_err}"

    print("KERNEL_OK")
</pallas_src>

<mosaic_0001>
module attributes {stable_mosaic.version = 11 : i64} {
  func.func @_block_in_kernel(%arg0: i32, %arg1: memref<1x18x18x4xf32, #tpu.memory_space<vmem>>, %arg2: memref<9x4x128xf32, #tpu.memory_space<vmem>>, %arg3: memref<1x256x128xf32, #tpu.memory_space<vmem>>, %arg4: memref<256x128xf32, #tpu.memory_space<vmem>>) attributes {dimension_semantics = [#tpu.dimension_semantics<parallel>], iteration_bounds = array<i64: 2>, scalar_prefetch = 0 : i64, scratch_operands = 1 : i64, tpu.core_type = #tpu.core_type<tc>, window_params = [{transform_indices = @transform_0, window_bounds = array<i64: 1, 18, 18, 4>}, {pipeline_mode = #tpu.pipeline_mode<synchronous>, transform_indices = @transform_1, window_bounds = array<i64: 9, 4, 128>}, {transform_indices = @transform_2, window_bounds = array<i64: 1, 256, 128>}]} {
    %cst = arith.constant 0.000000e+00 : f32
    %0 = vector.broadcast %cst : f32 to vector<256x128xf32>
    %c0 = arith.constant 0 : index
    %c0_0 = arith.constant 0 : index
    %1 = vector.load %arg4[%c0, %c0_0] : memref<256x128xf32, #tpu.memory_space<vmem>>, vector<256x128xf32>
    tpu.vector_store %arg4[%c0, %c0_0], %0 {strides = array<i32>} : memref<256x128xf32, #tpu.memory_space<vmem>>, vector<256x128xf32>,
    %c0_1 = arith.constant 0 : index
    %c0_2 = arith.constant 0 : index
    %c0_3 = arith.constant 0 : index
    %c0_4 = arith.constant 0 : index
    %2 = vector.load %arg1[%c0_1, %c0_2, %c0_3, %c0_4] : memref<1x18x18x4xf32, #tpu.memory_space<vmem>>, vector<1x16x16x4xf32>
    %3 = vector.shape_cast %2 : vector<1x16x16x4xf32> to vector<16x16x4xf32>
    %4 = vector.shape_cast %3 : vector<16x16x4xf32> to vector<256x4xf32>
    %c0_5 = arith.constant 0 : index
    %c0_6 = arith.constant 0 : index
    %5 = vector.load %arg4[%c0_5, %c0_6] : memref<256x128xf32, #tpu.memory_space<vmem>>, vector<256x128xf32>
    %c0_7 = arith.constant 0 : index
    %c0_8 = arith.constant 0 : index
    %c0_9 = arith.constant 0 : index
    %6 = vector.load %arg2[%c0_7, %c0_8, %c0_9] : memref<9x4x128xf32, #tpu.memory_space<vmem>>, vector<1x4x128xf32>
    %7 = vector.shape_cast %6 : vector<1x4x128xf32> to vector<4x128xf32>
    %cst_10 = arith.constant dense<0.000000e+00> : vector<256x128xf32>
    %8 = tpu.matmul %4, %7, %cst_10 {dimension_numbers = #tpu.dot_dimension_numbers<[1], [0], [0], [1], [0, 0, 1, 1], [], []>} : vector<256x4xf32>, vector<4x128xf32>, vector<256x128xf32> -> vector<256x128xf32>
    %9 = arith.addf %5, %8 : vector<256x128xf32>
    %c0_11 = arith.constant 0 : index
    %c0_12 = arith.constant 0 : index
    %10 = vector.load %arg4[%c0_11, %c0_12] : memref<256x128xf32, #tpu.memory_space<vmem>>, vector<256x128xf32>
    tpu.vector_store %arg4[%c0_11, %c0_12], %9 {strides = array<i32>} : memref<256x128xf32, #tpu.memory_space<vmem>>, vector<256x128xf32>,
    %c0_13 = arith.constant 0 : index
    %c0_14 = arith.constant 0 : index
    %c1 = arith.constant 1 : index
    %c0_15 = arith.constant 0 : index
    %11 = vector.load %arg1[%c0_13, %c0_14, %c1, %c0_15] : memref<1x18x18x4xf32, #tpu.memory_space<vmem>>, vector<1x16x16x4xf32>
    %12 = vector.shape_cast %11 : vector<1x16x16x4xf32> to vector<16x16x4xf32>
    %13 = vector.shape_cast %12 : vector<16x16x4xf32> to vector<256x4xf32>
    %c0_16 = arith.constant 0 : index
    %c0_17 = arith.constant 0 : index
    %14 = vector.load %arg4[%c0_16, %c0_17] : memref<256x128xf32, #tpu.memory_space<vmem>>, vector<256x128xf32>
    %c1_18 = arith.constant 1 : index
    %c0_19 = arith.constant 0 : index
    %c0_20 = arith.constant 0 : index
    %15 = vector.load %arg2[%c1_18, %c0_19, %c0_20] : memref<9x4x128xf32, #tpu.memory_space<vmem>>, vector<1x4x128xf32>
    %16 = vector.shape_cast %15 : vector<1x4x128xf32> to vector<4x128xf32>
    %cst_21 = arith.constant dense<0.000000e+00> : vector<256x128xf32>
    %17 = tpu.matmul %13, %16, %cst_21 {dimension_numbers = #tpu.dot_dimension_numbers<[1], [0], [0], [1], [0, 0, 1, 1], [], []>} : vector<256x4xf32>, vector<4x128xf32>, vector<256x128xf32> -> vector<256x128xf32>
    %18 = arith.addf %14, %17 : vector<256x128xf32>
    %c0_22 = arith.constant 0 : index
    %c0_23 = arith.constant 0 : index
    %19 = vector.load %arg4[%c0_22, %c0_23] : memref<256x128xf32, #tpu.memory_space<vmem>>, vector<256x128xf32>
    tpu.vector_store %arg4[%c0_22, %c0_23], %18 {strides = array<i32>} : memref<256x128xf32, #tpu.memory_space<vmem>>, vector<256x128xf32>,
    %c0_24 = arith.constant 0 : index
    %c0_25 = arith.constant 0 : index
    %c2 = arith.constant 2 : index
    %c0_26 = arith.constant 0 : index
    %20 = vector.load %arg1[%c0_24, %c0_25, %c2, %c0_26] : memref<1x18x18x4xf32, #tpu.memory_space<vmem>>, vector<1x16x16x4xf32>
    %21 = vector.shape_cast %20 : vector<1x16x16x4xf32> to vector<16x16x4xf32>
    %22 = vector.shape_cast %21 : vector<16x16x4xf32> to vector<256x4xf32>
    %c0_27 = arith.constant 0 : index
    %c0_28 = arith.constant 0 : index
    %23 = vector.load %arg4[%c0_27, %c0_28] : memref<256x128xf32, #tpu.memory_space<vmem>>, vector<256x128xf32>
    %c2_29 = arith.constant 2 : index
    %c0_30 = arith.constant 0 : index
    %c0_31 = arith.constant 0 : index
    %24 = vector.load %arg2[%c2_29, %c0_30, %c0_31] : memref<9x4x128xf32, #tpu.memory_space<vmem>>, vector<1x4x128xf32>
    %25 = vector.shape_cast %24 : vector<1x4x128xf32> to vector<4x128xf32>
    %cst_32 = arith.constant dense<0.000000e+00> : vector<256x128xf32>
    %26 = tpu.matmul %22, %25, %cst_32 {dimension_numbers = #tpu.dot_dimension_numbers<[1], [0], [0], [1], [0, 0, 1, 1], [], []>} : vector<256x4xf32>, vector<4x128xf32>, vector<256x128xf32> -> vector<256x128xf32>
    %27 = arith.addf %23, %26 : vector<256x128xf32>
    %c0_33 = arith.constant 0 : index
    %c0_34 = arith.constant 0 : index
    %28 = vector.load %arg4[%c0_33, %c0_34] : memref<256x128xf32, #tpu.memory_space<vmem>>, vector<256x128xf32>
    tpu.vector_store %arg4[%c0_33, %c0_34], %27 {strides = array<i32>} : memref<256x128xf32, #tpu.memory_space<vmem>>, vector<256x128xf32>,
    %c0_35 = arith.constant 0 : index
    %c1_36 = arith.constant 1 : index
    %c0_37 = arith.constant 0 : index
    %c0_38 = arith.constant 0 : index
    %29 = vector.load %arg1[%c0_35, %c1_36, %c0_37, %c0_38] : memref<1x18x18x4xf32, #tpu.memory_space<vmem>>, vector<1x16x16x4xf32>
    %30 = vector.shape_cast %29 : vector<1x16x16x4xf32> to vector<16x16x4xf32>
    %31 = vector.shape_cast %30 : vector<16x16x4xf32> to vector<256x4xf32>
    %c0_39 = arith.constant 0 : index
    %c0_40 = arith.constant 0 : index
    %32 = vector.load %arg4[%c0_39, %c0_40] : memref<256x128xf32, #tpu.memory_space<vmem>>, vector<256x128xf32>
    %c3 = arith.constant 3 : index
    %c0_41 = arith.constant 0 : index
    %c0_42 = arith.constant 0 : index
    %33 = vector.load %arg2[%c3, %c0_41, %c0_42] : memref<9x4x128xf32, #tpu.memory_space<vmem>>, vector<1x4x128xf32>
    %34 = vector.shape_cast %33 : vector<1x4x128xf32> to vector<4x128xf32>
    %cst_43 = arith.constant dense<0.000000e+00> : vector<256x128xf32>
    %35 = tpu.matmul %31, %34, %cst_43 {dimension_numbers = #tpu.dot_dimension_numbers<[1], [0], [0], [1], [0, 0, 1, 1], [], []>} : vector<256x4xf32>, vector<4x128xf32>, vector<256x128xf32> -> vector<256x128xf32>
    %36 = arith.addf %32, %35 : vector<256x128xf32>
    %c0_44 = arith.constant 0 : index
    %c0_45 = arith.constant 0 : index
    %37 = vector.load %arg4[%c0_44, %c0_45] : memref<256x128xf32, #tpu.memory_space<vmem>>, vector<256x128xf32>
    tpu.vector_store %arg4[%c0_44, %c0_45], %36 {strides = array<i32>} : memref<256x128xf32, #tpu.memory_space<vmem>>, vector<256x128xf32>,
    %c0_46 = arith.constant 0 : index
    %c1_47 = arith.constant 1 : index
    %c1_48 = arith.constant 1 : index
    %c0_49 = arith.constant 0 : index
    %38 = vector.load %arg1[%c0_46, %c1_47, %c1_48, %c0_49] : memref<1x18x18x4xf32, #tpu.memory_space<vmem>>, vector<1x16x16x4xf32>
    %39 = vector.shape_cast %38 : vector<1x16x16x4xf32> to vector<16x16x4xf32>
    %40 = vector.shape_cast %39 : vector<16x16x4xf32> to vector<256x4xf32>
    %c0_50 = arith.constant 0 : index
    %c0_51 = arith.constant 0 : index
    %41 = vector.load %arg4[%c0_50, %c0_51] : memref<256x128xf32, #tpu.memory_space<vmem>>, vector<256x128xf32>
    %c4 = arith.constant 4 : index
    %c0_52 = arith.constant 0 : index
    %c0_53 = arith.constant 0 : index
    %42 = vector.load %arg2[%c4, %c0_52, %c0_53] : memref<9x4x128xf32, #tpu.memory_space<vmem>>, vector<1x4x128xf32>
    %43 = vector.shape_cast %42 : vector<1x4x128xf32> to vector<4x128xf32>
    %cst_54 = arith.constant dense<0.000000e+00> : vector<256x128xf32>
    %44 = tpu.matmul %40, %43, %cst_54 {dimension_numbers = #tpu.dot_dimension_numbers<[1], [0], [0], [1], [0, 0, 1, 1], [], []>} : vector<256x4xf32>, vector<4x128xf32>, vector<256x128xf32> -> vector<256x128xf32>
    %45 = arith.addf %41, %44 : vector<256x128xf32>
    %c0_55 = arith.constant 0 : index
    %c0_56 = arith.constant 0 : index
    %46 = vector.load %arg4[%c0_55, %c0_56] : memref<256x128xf32, #tpu.memory_space<vmem>>, vector<256x128xf32>
    tpu.vector_store %arg4[%c0_55, %c0_56], %45 {strides = array<i32>} : memref<256x128xf32, #tpu.memory_space<vmem>>, vector<256x128xf32>,
    %c0_57 = arith.constant 0 : index
    %c1_58 = arith.constant 1 : index
    %c2_59 = arith.constant 2 : index
    %c0_60 = arith.constant 0 : index
    %47 = vector.load %arg1[%c0_57, %c1_58, %c2_59, %c0_60] : memref<1x18x18x4xf32, #tpu.memory_space<vmem>>, vector<1x16x16x4xf32>
    %48 = vector.shape_cast %47 : vector<1x16x16x4xf32> to vector<16x16x4xf32>
    %49 = vector.shape_cast %48 : vector<16x16x4xf32> to vector<256x4xf32>
    %c0_61 = arith.constant 0 : index
    %c0_62 = arith.constant 0 : index
    %50 = vector.load %arg4[%c0_61, %c0_62] : memref<256x128xf32, #tpu.memory_space<vmem>>, vector<256x128xf32>
    %c5 = arith.constant 5 : index
    %c0_63 = arith.constant 0 : index
    %c0_64 = arith.constant 0 : index
    %51 = vector.load %arg2[%c5, %c0_63, %c0_64] : memref<9x4x128xf32, #tpu.memory_space<vmem>>, vector<1x4x128xf32>
    %52 = vector.shape_cast %51 : vector<1x4x128xf32> to vector<4x128xf32>
    %cst_65 = arith.constant dense<0.000000e+00> : vector<256x128xf32>
    %53 = tpu.matmul %49, %52, %cst_65 {dimension_numbers = #tpu.dot_dimension_numbers<[1], [0], [0], [1], [0, 0, 1, 1], [], []>} : vector<256x4xf32>, vector<4x128xf32>, vector<256x128xf32> -> vector<256x128xf32>
    %54 = arith.addf %50, %53 : vector<256x128xf32>
    %c0_66 = arith.constant 0 : index
    %c0_67 = arith.constant 0 : index
    %55 = vector.load %arg4[%c0_66, %c0_67] : memref<256x128xf32, #tpu.memory_space<vmem>>, vector<256x128xf32>
    tpu.vector_store %arg4[%c0_66, %c0_67], %54 {strides = array<i32>} : memref<256x128xf32, #tpu.memory_space<vmem>>, vector<256x128xf32>,
    %c0_68 = arith.constant 0 : index
    %c2_69 = arith.constant 2 : index
    %c0_70 = arith.constant 0 : index
    %c0_71 = arith.constant 0 : index
    %56 = vector.load %arg1[%c0_68, %c2_69, %c0_70, %c0_71] : memref<1x18x18x4xf32, #tpu.memory_space<vmem>>, vector<1x16x16x4xf32>
    %57 = vector.shape_cast %56 : vector<1x16x16x4xf32> to vector<16x16x4xf32>
    %58 = vector.shape_cast %57 : vector<16x16x4xf32> to vector<256x4xf32>
    %c0_72 = arith.constant 0 : index
    %c0_73 = arith.constant 0 : index
    %59 = vector.load %arg4[%c0_72, %c0_73] : memref<256x128xf32, #tpu.memory_space<vmem>>, vector<256x128xf32>
    %c6 = arith.constant 6 : index
    %c0_74 = arith.constant 0 : index
    %c0_75 = arith.constant 0 : index
    %60 = vector.load %arg2[%c6, %c0_74, %c0_75] : memref<9x4x128xf32, #tpu.memory_space<vmem>>, vector<1x4x128xf32>
    %61 = vector.shape_cast %60 : vector<1x4x128xf32> to vector<4x128xf32>
    %cst_76 = arith.constant dense<0.000000e+00> : vector<256x128xf32>
    %62 = tpu.matmul %58, %61, %cst_76 {dimension_numbers = #tpu.dot_dimension_numbers<[1], [0], [0], [1], [0, 0, 1, 1], [], []>} : vector<256x4xf32>, vector<4x128xf32>, vector<256x128xf32> -> vector<256x128xf32>
    %63 = arith.addf %59, %62 : vector<256x128xf32>
    %c0_77 = arith.constant 0 : index
    %c0_78 = arith.constant 0 : index
    %64 = vector.load %arg4[%c0_77, %c0_78] : memref<256x128xf32, #tpu.memory_space<vmem>>, vector<256x128xf32>
    tpu.vector_store %arg4[%c0_77, %c0_78], %63 {strides = array<i32>} : memref<256x128xf32, #tpu.memory_space<vmem>>, vector<256x128xf32>,
    %c0_79 = arith.constant 0 : index
    %c2_80 = arith.constant 2 : index
    %c1_81 = arith.constant 1 : index
    %c0_82 = arith.constant 0 : index
    %65 = vector.load %arg1[%c0_79, %c2_80, %c1_81, %c0_82] : memref<1x18x18x4xf32, #tpu.memory_space<vmem>>, vector<1x16x16x4xf32>
    %66 = vector.shape_cast %65 : vector<1x16x16x4xf32> to vector<16x16x4xf32>
    %67 = vector.shape_cast %66 : vector<16x16x4xf32> to vector<256x4xf32>
    %c0_83 = arith.constant 0 : index
    %c0_84 = arith.constant 0 : index
    %68 = vector.load %arg4[%c0_83, %c0_84] : memref<256x128xf32, #tpu.memory_space<vmem>>, vector<256x128xf32>
    %c7 = arith.constant 7 : index
    %c0_85 = arith.constant 0 : index
    %c0_86 = arith.constant 0 : index
    %69 = vector.load %arg2[%c7, %c0_85, %c0_86] : memref<9x4x128xf32, #tpu.memory_space<vmem>>, vector<1x4x128xf32>
    %70 = vector.shape_cast %69 : vector<1x4x128xf32> to vector<4x128xf32>
    %cst_87 = arith.constant dense<0.000000e+00> : vector<256x128xf32>
    %71 = tpu.matmul %67, %70, %cst_87 {dimension_numbers = #tpu.dot_dimension_numbers<[1], [0], [0], [1], [0, 0, 1, 1], [], []>} : vector<256x4xf32>, vector<4x128xf32>, vector<256x128xf32> -> vector<256x128xf32>
    %72 = arith.addf %68, %71 : vector<256x128xf32>
    %c0_88 = arith.constant 0 : index
    %c0_89 = arith.constant 0 : index
    %73 = vector.load %arg4[%c0_88, %c0_89] : memref<256x128xf32, #tpu.memory_space<vmem>>, vector<256x128xf32>
    tpu.vector_store %arg4[%c0_88, %c0_89], %72 {strides = array<i32>} : memref<256x128xf32, #tpu.memory_space<vmem>>, vector<256x128xf32>,
    %c0_90 = arith.constant 0 : index
    %c2_91 = arith.constant 2 : index
    %c2_92 = arith.constant 2 : index
    %c0_93 = arith.constant 0 : index
    %74 = vector.load %arg1[%c0_90, %c2_91, %c2_92, %c0_93] : memref<1x18x18x4xf32, #tpu.memory_space<vmem>>, vector<1x16x16x4xf32>
    %75 = vector.shape_cast %74 : vector<1x16x16x4xf32> to vector<16x16x4xf32>
    %76 = vector.shape_cast %75 : vector<16x16x4xf32> to vector<256x4xf32>
    %c0_94 = arith.constant 0 : index
    %c0_95 = arith.constant 0 : index
    %77 = vector.load %arg4[%c0_94, %c0_95] : memref<256x128xf32, #tpu.memory_space<vmem>>, vector<256x128xf32>
    %c8 = arith.constant 8 : index
    %c0_96 = arith.constant 0 : index
    %c0_97 = arith.constant 0 : index
    %78 = vector.load %arg2[%c8, %c0_96, %c0_97] : memref<9x4x128xf32, #tpu.memory_space<vmem>>, vector<1x4x128xf32>
    %79 = vector.shape_cast %78 : vector<1x4x128xf32> to vector<4x128xf32>
    %cst_98 = arith.constant dense<0.000000e+00> : vector<256x128xf32>
    %80 = tpu.matmul %76, %79, %cst_98 {dimension_numbers = #tpu.dot_dimension_numbers<[1], [0], [0], [1], [0, 0, 1, 1], [], []>} : vector<256x4xf32>, vector<4x128xf32>, vector<256x128xf32> -> vector<256x128xf32>
    %81 = arith.addf %77, %80 : vector<256x128xf32>
    %c0_99 = arith.constant 0 : index
    %c0_100 = arith.constant 0 : index
    %82 = vector.load %arg4[%c0_99, %c0_100] : memref<256x128xf32, #tpu.memory_space<vmem>>, vector<256x128xf32>
    tpu.vector_store %arg4[%c0_99, %c0_100], %81 {strides = array<i32>} : memref<256x128xf32, #tpu.memory_space<vmem>>, vector<256x128xf32>,
    %c0_101 = arith.constant 0 : index
    %c0_102 = arith.constant 0 : index
    %83 = vector.load %arg4[%c0_101, %c0_102] : memref<256x128xf32, #tpu.memory_space<vmem>>, vector<256x128xf32>
    %cst_103 = arith.constant dense<0.000000e+00> : vector<128xf32>
    %84 = vector.multi_reduction <add>, %83, %cst_103 [0] : vector<256x128xf32> to vector<128xf32>
    %85 = vector.shape_cast %84 : vector<128xf32> to vector<1x128xf32>
    %cst_104 = arith.constant 2.560000e+02 : f32
    %86 = vector.broadcast %cst_104 : f32 to vector<1x128xf32>
    %87 = arith.divf %85, %86 : vector<1x128xf32>
    %88 = vector.broadcast %87 : vector<1x128xf32> to vector<256x128xf32>
    %89 = arith.subf %83, %88 : vector<256x128xf32>
    %90 = arith.mulf %89, %89 : vector<256x128xf32>
    %cst_105 = arith.constant dense<0.000000e+00> : vector<128xf32>
    %91 = vector.multi_reduction <add>, %90, %cst_105 [0] : vector<256x128xf32> to vector<128xf32>
    %92 = vector.shape_cast %91 : vector<128xf32> to vector<1x128xf32>
    %cst_106 = arith.constant 2.560000e+02 : f32
    %93 = vector.broadcast %cst_106 : f32 to vector<1x128xf32>
    %94 = arith.divf %92, %93 : vector<1x128xf32>
    %95 = vector.broadcast %87 : vector<1x128xf32> to vector<256x128xf32>
    %96 = arith.subf %83, %95 : vector<256x128xf32>
    %cst_107 = arith.constant 9.99999974E-6 : f32
    %97 = vector.broadcast %cst_107 : f32 to vector<1x128xf32>
    %98 = arith.addf %94, %97 : vector<1x128xf32>
    %99 = math.rsqrt %98 : vector<1x128xf32>
    %100 = vector.broadcast %99 : vector<1x128xf32> to vector<256x128xf32>
    %101 = arith.mulf %96, %100 : vector<256x128xf32>
    %cst_108 = arith.constant 0.000000e+00 : f32
    %102 = vector.broadcast %cst_108 : f32 to vector<256x128xf32>
    %103 = arith.maximumf %101, %102 : vector<256x128xf32>
    %c0_109 = arith.constant 0 : index
    %c0_110 = arith.constant 0 : index
    %c0_111 = arith.constant 0 : index
    %104 = vector.load %arg3[%c0_109, %c0_110, %c0_111] : memref<1x256x128xf32, #tpu.memory_space<vmem>>, vector<1x256x128xf32>
    %105 = vector.shape_cast %104 : vector<1x256x128xf32> to vector<256x128xf32>
    %106 = vector.shape_cast %103 : vector<256x128xf32> to vector<1x256x128xf32>
    tpu.vector_store %arg3[%c0_109, %c0_110, %c0_111], %106 {strides = array<i32>} : memref<1x256x128xf32, #tpu.memory_space<vmem>>, vector<1x256x128xf32>,
    return
  }
  func.func @transform_0(%arg0: i32) -> (i32, i32, i32, i32) {
    %c0_i32 = arith.constant 0 : i32
    %c0_i32_0 = arith.constant 0 : i32
    %c0_i32_1 = arith.constant 0 : i32
    %c0_i32_2 = arith.constant 0 : i32
    return %arg0, %c0_i32, %c0_i32_0, %c0_i32_1 : i32, i32, i32, i32
  }
  func.func @transform_1(%arg0: i32) -> (i32, i32, i32) {
    %c0_i32 = arith.constant 0 : i32
    %c0_i32_0 = arith.constant 0 : i32
    %c0_i32_1 = arith.constant 0 : i32
    %c0_i32_2 = arith.constant 0 : i32
    return %c0_i32, %c0_i32_0, %c0_i32_1 : i32, i32, i32
  }
  func.func @transform_2(%arg0: i32) -> (i32, i32, i32) {
    %c0_i32 = arith.constant 0 : i32
    %c0_i32_0 = arith.constant 0 : i32
    %c0_i32_1 = arith.constant 0 : i32
    return %arg0, %c0_i32, %c0_i32_0 : i32, i32, i32
  }
}

</mosaic_0001>

<bundles_post_ra>
// kernel: block_in_forward.1
= control target key start
LH: loop header
LB: loop body
LE: loop exit
PB: predicated region body
PF: predicated region fallthrough
CT: control target
= control target key end

     0   :  { %7 = vsyncpa [#allocation4], 0  ;;  %s7615_s0 = inlined_call_operand.vmem [shape: f32[2,18,18,4], index: 0, kind: input, shape index: {}]   ;;  %s7616_s1 = inlined_call_operand.vmem [shape: f32[9,4,128], index: 1, kind: input, shape index: {}]   ;;  %s7617_s2 = inlined_call_operand.hbm [shape: f32[2,256,128], index: 2, kind: output, shape index: {}]  }
   0x1   :  { %9 = vsyncpa [#allocation4 + $0x1], 0  ;;  %s6250_s9 = smov 0   ;;  %s6252_s10 = smov 0  }
   0x2   :  { %s6254_s11 = smov 0   ;;  %s6256_s12 = smov 0  }
   0x3 LB: > { %s6271_s13 = sadd.s32 4294967295, %s6230_s12   ;;  %s4610_s14 = sadd.s32 4294967294, %s6230_s12   ;;  %s6230_s12 = sphi %s6256_s12, %s7743_s12   ;;  %s6226_s11 = sphi %s6254_s11, %s7742_s11   ;;  %s6222_s10 = sphi %s6252_s10, %s7741_s10   ;;  %s6218_s9 = sphi %s6250_s9, %s7740_s9  }
   0x4   : > { %s6275_s15 = sadd.s32 1, %s6230_s12   ;;  %s69_s16 = sadd.s32 1, %s6226_s11 }
   0x5   : > { %s66_s17 = ssub.s32 %s6230_s12, %s6275_s15  ;;  %p79_p0 = scmp.ne.s32.totalorder %s6226_s11, %s6222_s10 }
   0x6   : > { %p67_p1 = scmp.eq.s32.totalorder %s66_s17, 0  ;;  %p80_p2 = scmp.eq.s32.totalorder %s6271_s13, 1 }
   0x7   : > { %p85_p3 = scmp.ne.s32.totalorder %s6222_s10, %s6218_s9  ;;  %p86_p4 = scmp.eq.s32.totalorder %s4610_s14, 1 }
   0x8   : > { %s6286_s18 = scalar_select %p67_p1, %s6226_s11, %s69_s16  }
   0x9   : > { %p6288_p5 = por %p80_p2, %p79_p0  ;;  %p6292_p6 = por %p86_p4, %p85_p3 }
   0xa   : > { %p4613_p7 = scmp.ge.s32.totalorder %s6230_s12, 1  ;;  %p115_p8 = scmp.lt.s32.totalorder %s6230_s12, 3 }
   0xc   : > { %p116_p9 = pnand %p4613_p7, %p115_p8 }
   0xe   : > { %119 = sbr.rel (%p116_p9) target bundleno = 687 (0x2af), region = 28 }
  0x15   : > { %v238_v0 = vld [vmem:[%s7616_s1] sm:$0xf]  ;;  %vm336_vm0 = vcmask 1043456   ;;  %v6304_v1 = vld [vmem:[%s7616_s1 + $0x10] sm:$0xf]  ;;  %p137_p10 = scmp.lt.s32.totalorder %s6271_s13, 1 }
  0x16   : > { %5416 = vmatprep.subr.msk.mxu1 %vm336_vm0, %v238_v0  ;;  %5616 = vmatprep.subr.msk.mxu0 %vm336_vm0, %v6304_v1  ;;  %v4649_v2 = vld [vmem:[%s7616_s1 + $0x4] sm:$0xf]  ;;  %v4881_v3 = vld [vmem:[%s7616_s1 + $0x14] sm:$0xf]  ;;  %vm239_vm1 = vcmask 31744   ;;  %s134_s25 = sand.u32 1, %s6222_s10  }
  0x17   : > { %5417 = vmatpush3.msk.msra.mxu1 %vm336_vm0, %v238_v0  ;;  %5617 = vmatpush3.msk.msra.mxu0 %vm336_vm0, %v6304_v1  ;;  %s138_s29 = scalar_select %p137_p10, %s6271_s13, 1  ;;  %v6350_v10 = vld [vmem:[%s7616_s1 + $0x18] sm:$0xf]  ;;  %v6355_v11 = vld [vmem:[%s7616_s1 + $0x8] sm:$0xf] }
  0x18   : > { %5466 = vmatprep.subr.msk.mxu1 %vm336_vm0, %v4649_v2  ;;  %5666 = vmatprep.subr.msk.mxu0 %vm336_vm0, %v4881_v3  ;;  %v6522_v44 = vld [vmem:[%s7616_s1 + $0x1c] sm:$0xf]  ;;  %s4614_s26 = sshll.u32 %s134_s25, 8  ;;  %s5118_s28 = sshll.u32 %s6271_s13, 12 }
  0x19   : > { %s6124_s30 = smul.u32 432, %s138_s29  ;;  %s7476_s27 = scalar_lea.vmem [#allocation3], %s4614_s26 }
  0x1a   : > { %s4548_s29 = sshll.u32 %s7476_s27, 4  ;;  %s7552_s3 = scalar_lea.hbm %s7617_s2, %s5118_s28  ;;  %s7554_s29 = int_to_ptr.vmem [resolvable:$true] %s4548_s29 }
  0x1b   : > { %s6325_s5 = scalar_lea.vmem %s7615_s0, %s6124_s30  ;;  %s7574_s4 = scalar_lea.sflag [#allocation4], %s134_s25 }
  0x1c   : > { %v174_v4 = vld [vmem:[%s6325_s5] sm:$0xff]  ;;  %v175_v6 = vld [vmem:[%s6325_s5 + $0x8] sm:$0xff]  ;;  %v6339_v8 = vld [vmem:[%s6325_s5 + $0x18] sm:$0xff]  ;;  %s6232_s6 = smov [#allocation3]  }
  0x1d   : > { %v6329_v5 = vld [vmem:[%s6325_s5 + $0x19] sm:$0xff]  ;;  %5418 = vmatprep.mubr.msk.f32.mxu1 %vm239_vm1, %v174_v4  ;;  %v6336_v7 = vld [vmem:[%s6325_s5 + $0x21] sm:$0xff]  ;;  %7670 = vst [vmem:[#allocation6_spill] sm:$0xff] %v6339_v8  ;;  %v6342_v9 = vld [vmem:[%s6325_s5 + $0x31] sm:$0xff]  ;;  %s6172_s7 = sshll.u32 %s6232_s6, 4  ;;  %s6173_s7 = int_to_ptr.vmem [resolvable:$false] %s6172_s7 }
  0x1e   : > { %5618 = vmatprep.mubr.msk.f32.mxu0 %vm239_vm1, %v6329_v5  ;;  %5419 = vmatmul.mubr.msk.f32.vlgmr.msra.gmra.mrb[0].mxu1 %vm239_vm1, %v175_v6  ;;  %v6360_v12 = vld [vmem:[%s6325_s5 + $0x20] sm:$0xff]  ;;  %v6370_v14 = vld [vmem:[%s6325_s5 + $0x30] sm:$0xff]  ;;  %v6388_v16 = vld [vmem:[%s6325_s5 + $0x38] sm:$0xff]  ;;  %s6174_s8 = scalar_lea.vmem %s6173_s7, 8192  ;;  %p6175_p0 = scmp.lt.s32.totalorder %s7554_s29, %s6173_s7 }
  0x1f   : > { %5619 = vmatmul.mubr.msk.f32.vlgmr.msra.gmra.mrb[0].mxu0 %vm239_vm1, %v6336_v7  ;;  %5467 = vmatpush3.msk.msra.mxu1 %vm336_vm0, %v4649_v2  ;;  %7671 = vst [vmem:[#allocation7_spill] sm:$0xff] %v6360_v12  ;;  %v6363_v13 = vld [vmem:[%s6325_s5 + $0x39] sm:$0xff]  ;;  %7672 = vst [vmem:[#allocation8_spill] sm:$0xff] %v6370_v14  ;;  %v6373_v15 = vld [vmem:[%s6325_s5 + $0x49] sm:$0xff] }
  0x20   : > { %5667 = vmatpush3.msk.msra.mxu0 %vm336_vm0, %v4881_v3  ;;  %5421 = vmatprep.mubr.msk.f32.mxu1 %vm239_vm1, %v6339_v8  ;;  %v6391_v17 = vld [vmem:[%s6325_s5 + $0x51] sm:$0xff]  ;;  %v6394_v18 = vld [vmem:[%s6325_s5 + $0x48] sm:$0xff]  ;;  %v6414_v22 = vld [vmem:[%s6325_s5 + $0x60] sm:$0xff] }
  0x21   : > { %5621 = vmatprep.mubr.msk.f32.mxu0 %vm239_vm1, %v6342_v9  ;;  %5716 = vmatprep.subr.msk.mxu0 %vm336_vm0, %v6350_v10  ;;  %7673 = vst [vmem:[#allocation9_spill] sm:$0xff] %v6394_v18  ;;  %v6397_v19 = vld [vmem:[%s6325_s5 + $0x61] sm:$0xff]  ;;  %v6408_v20 = vld [vmem:[%s6325_s5 + $0x50] sm:$0xff]  ;;  %7675 = vst [vmem:[#allocation11_spill] sm:$0xff] %v6414_v22 }
  0x22   : > { %5516 = vmatprep.subr.msk.mxu1 %vm336_vm0, %v6355_v11  ;;  %5422 = vmatmul.mubr.msk.f32.gmra.mrb[2].mxu1 %vm239_vm1, %v6360_v12  ;;  %7674 = vst [vmem:[#allocation10_spill] sm:$0xff] %v6408_v20  ;;  %v6411_v21 = vld [vmem:[%s6325_s5 + $0x69] sm:$0xff]  ;;  %v6417_v23 = vld [vmem:[%s6325_s5 + $0x79] sm:$0xff]  ;;  %v6431_v25 = vld [vmem:[%s6325_s5 + $0x81] sm:$0xff] }
  0x23   : > { %5622 = vmatmul.mubr.msk.f32.gmra.mrb[2].mxu0 %vm239_vm1, %v6363_v13  ;;  %5424 = vmatprep.mubr.msk.f32.mxu1 %vm239_vm1, %v6370_v14  ;;  %v6428_v24 = vld [vmem:[%s6325_s5 + $0x68] sm:$0xff]  ;;  %v6434_v26 = vld [vmem:[%s6325_s5 + $0x78] sm:$0xff]  ;;  %v6448_v28 = vld [vmem:[%s6325_s5 + $0x80] sm:$0xff] }
  0x24   : > { %5624 = vmatprep.mubr.msk.f32.mxu0 %vm239_vm1, %v6373_v15  ;;  %7676 = vst [vmem:[#allocation12_spill] sm:$0xff] %v6428_v24  ;;  %7677 = vst [vmem:[#allocation13_spill] sm:$0xff] %v6434_v26  ;;  %v6437_v27 = vld [vmem:[%s6325_s5 + $0x91] sm:$0xff]  ;;  %v6451_v29 = vld [vmem:[%s6325_s5 + $0x99] sm:$0xff] }
  0x25   : > { %7678 = vst [vmem:[#allocation14_spill] sm:$0xff] %v6448_v28  ;;  %v6454_v30 = vld [vmem:[%s6325_s5 + $0x90] sm:$0xff]  ;;  %v6468_v32 = vld [vmem:[%s6325_s5 + $0x98] sm:$0xff]  ;;  %v6474_v34 = vld [vmem:[%s6325_s5 + $0xa8] sm:$0xff] }
  0x26   : > { %5425 = vmatmul.mubr.msk.f32.gmra.mrb[4].mxu1 %vm239_vm1, %v6388_v16  ;;  %7679 = vst [vmem:[#allocation15_spill] sm:$0xff] %v6454_v30  ;;  %v6457_v31 = vld [vmem:[%s6325_s5 + $0xa9] sm:$0xff]  ;;  %7680 = vst [vmem:[#allocation16_spill] sm:$0xff] %v6468_v32  ;;  %v6471_v33 = vld [vmem:[%s6325_s5 + $0xb1] sm:$0xff] }
  0x27   : > { %5625 = vmatmul.mubr.msk.f32.gmra.mrb[4].mxu0 %vm239_vm1, %v6391_v17  ;;  %5427 = vmatprep.mubr.msk.f32.mxu1 %vm239_vm1, %v6394_v18  ;;  %7681 = vst [vmem:[#allocation17_spill] sm:$0xff] %v6474_v34  ;;  %v6477_v35 = vld [vmem:[%s6325_s5 + $0xc1] sm:$0xff]  ;;  %v6488_v36 = vld [vmem:[%s6325_s5 + $0xb0] sm:$0xff]  ;;  %v6514_v42 = vld [vmem:[%s6325_s5 + $0xd8] sm:$0xff] }
  0x28   : > { %5627 = vmatprep.mubr.msk.f32.mxu0 %vm239_vm1, %v6397_v19  ;;  %7682 = vst [vmem:[#allocation18_spill] sm:$0xff] %v6488_v36  ;;  %v6491_v37 = vld [vmem:[%s6325_s5 + $0xc9] sm:$0xff]  ;;  %v6494_v38 = vld [vmem:[%s6325_s5 + $0xc0] sm:$0xff]  ;;  %v6517_v43 = vld [vmem:[%s6325_s5 + $0x32] sm:$0xff] }
  0x29   : > { %v6497_v39 = vld [vmem:[%s6325_s5 + $0x1a] sm:$0xff]  ;;  %v6508_v40 = vld [vmem:[%s6325_s5 + $0xc8] sm:$0xff]  ;;  %v6541_v47 = vld [vmem:[%s6325_s5 + $0xf0] sm:$0xff] }
  0x2a   : > { %5428 = vmatmul.mubr.msk.f32.gmra.mrb[6].mxu1 %vm239_vm1, %v6408_v20  ;;  %7683 = vst [vmem:[#allocation19_spill] sm:$0xff] %v6508_v40  ;;  %v6511_v41 = vld [vmem:[%s6325_s5 + $0x22] sm:$0xff]  ;;  %v6536_v46 = vld [vmem:[%s6325_s5 + $0x3a] sm:$0xff]  ;;  %v6544_v48 = vld [vmem:[%s6325_s5 + $0x4a] sm:$0xff] }
  0x2b   : > { %5628 = vmatmul.mubr.msk.f32.gmra.mrb[6].mxu0 %vm239_vm1, %v6411_v21  ;;  %5430 = vmatprep.mubr.msk.f32.mxu1 %vm239_vm1, %v6414_v22  ;;  %v6533_v45 = vld [vmem:[%s6325_s5 + $0xe0] sm:$0xff]  ;;  %v6557_v49 = vld [vmem:[%s6325_s5 + $0xf8] sm:$0xff]  ;;  %v6563_v51 = vld [vmem:[%s6325_s5 + $0x108] sm:$0xff] }
  0x2c   : > { %5630 = vmatprep.mubr.msk.f32.mxu0 %vm239_vm1, %v6417_v23  ;;  %v6560_v50 = vld [vmem:[%s6325_s5 + $0x52] sm:$0xff]  ;;  %v6566_v52 = vld [vmem:[%s6325_s5 + $0x62] sm:$0xff]  ;;  %v6580_v54 = vld [vmem:[%s6325_s5 + $0x6a] sm:$0xff] }
  0x2d   : > { %v6577_v53 = vld [vmem:[%s6325_s5 + $0x110] sm:$0xff]  ;;  %v6583_v55 = vld [vmem:[%s6325_s5 + $0x120] sm:$0xff]  ;;  %v6597_v57 = vld [vmem:[%s6325_s5 + $0x128] sm:$0xff] }
  0x2e   : > { %5431 = vmatmul.mubr.msk.f32.gmra.mrb[8].mxu1 %vm239_vm1, %v6428_v24  ;;  %v6586_v56 = vld [vmem:[%s6325_s5 + $0x7a] sm:$0xff]  ;;  %v6600_v58 = vld [vmem:[%s6325_s5 + $0x82] sm:$0xff]  ;;  %v6606_v60 = vld [vmem:[%s6325_s5 + $0x92] sm:$0xff] }
  0x2f   : > { %5631 = vmatmul.mubr.msk.f32.gmra.mrb[8].mxu0 %vm239_vm1, %v6431_v25  ;;  %5433 = vmatprep.mubr.msk.f32.mxu1 %vm239_vm1, %v6434_v26  ;;  %v6603_v59 = vld [vmem:[%s6325_s5 + $0x138] sm:$0xff]  ;;  %7684 = vst [vmem:[#allocation20_spill] sm:$0xff] %v6606_v60  ;;  %v6617_v61 = vld [vmem:[%s6325_s5 + $0x140] sm:$0xff]  ;;  %v6623_v63 = vld [vmem:[%s6325_s5 + $0x150] sm:$0xff] }
  0x30   : > { %5633 = vmatprep.mubr.msk.f32.mxu0 %vm239_vm1, %v6437_v27  ;;  %v6620_v62 = vld [vmem:[%s6325_s5 + $0x9a] sm:$0xff]  ;;  %v6626_v0 = vld [vmem:[%s6325_s5 + $0xaa] sm:$0xff]  ;;  %v6640_v3 = vld [vmem:[%s6325_s5 + $0xb2] sm:$0xff] }
  0x31   : > { %7685 = vst [vmem:[#allocation21_spill] sm:$0xff] %v6620_v62  ;;  %7686 = vst [vmem:[#allocation22_spill] sm:$0xff] %v6626_v0  ;;  %v6637_v2 = vld [vmem:[%s6325_s5 + $0x158] sm:$0xff]  ;;  %v6643_v4 = vld [vmem:[%s6325_s5 + $0x168] sm:$0xff] }
  0x32   : > { %5434 = vmatmul.mubr.msk.f32.gmra.mrb[10].mxu1 %vm239_vm1, %v6448_v28  ;;  %7687 = vst [vmem:[#allocation23_spill] sm:$0xff] %v6637_v2  ;;  %7688 = vst [vmem:[#allocation24_spill] sm:$0xff] %v6640_v3  ;;  %v6646_v6 = vld [vmem:[%s6325_s5 + $0xc2] sm:$0xff]  ;;  %v6660_v12 = vld [vmem:[%s6325_s5 + $0xca] sm:$0xff] }
  0x33   : > { %5634 = vmatmul.mubr.msk.f32.gmra.mrb[10].mxu0 %vm239_vm1, %v6451_v29  ;;  %5436 = vmatprep.mubr.msk.f32.mxu1 %vm239_vm1, %v6454_v30  ;;  %7689 = vst [vmem:[#allocation25_spill] sm:$0xff] %v6643_v4  ;;  %7690 = vst [vmem:[#allocation26_spill] sm:$0xff] %v6646_v6  ;;  %v629_v8 = vld [vmem:[%s6325_s5 + $0x1] sm:$0xff] }
  0x34   : > { %5636 = vmatprep.mubr.msk.f32.mxu0 %vm239_vm1, %v6457_v31 }
  0x36   : > { %5437 = vmatmul.mubr.msk.f32.gmra.mrb[12].mxu1 %vm239_vm1, %v6468_v32 }
  0x37   : > { %5637 = vmatmul.mubr.msk.f32.gmra.mrb[12].mxu0 %vm239_vm1, %v6471_v33  ;;  %5439 = vmatprep.mubr.msk.f32.mxu1 %vm239_vm1, %v6474_v34 }
  0x38   : > { %5639 = vmatprep.mubr.msk.f32.mxu0 %vm239_vm1, %v6477_v35 }
  0x3a   : > { %5440 = vmatmul.mubr.msk.f32.gmra.mrb[14].mxu1 %vm239_vm1, %v6488_v36 }
  0x3b   : > { %5640 = vmatmul.mubr.msk.f32.gmra.mrb[14].mxu0 %vm239_vm1, %v6491_v37  ;;  %5442 = vmatprep.mubr.msk.f32.mxu1 %vm239_vm1, %v6494_v38 }
  0x3c   : > { %5668 = vmatprep.mubr.msk.f32.mxu0 %vm239_vm1, %v6497_v39 }
  0x3e   : > { %5443 = vmatmul.mubr.msk.f32.gmra.mrb[16].mxu1 %vm239_vm1, %v6508_v40 }
  0x3f   : > { %5669 = vmatmul.mubr.msk.f32.vlgmr.msra.gmra.mrb[0].mxu0 %vm239_vm1, %v6511_v41  ;;  %5445 = vmatprep.mubr.msk.f32.mxu1 %vm239_vm1, %v6514_v42 }
  0x40   : > { %5717 = vmatpush3.msk.msra.mxu0 %vm336_vm0, %v6350_v10  ;;  %5671 = vmatprep.mubr.msk.f32.mxu0 %vm239_vm1, %v6517_v43  ;;  %v6657_v10 = vld [vmem:[%s6325_s5 + $0x170] sm:$0xff] }
  0x41   : > { %5766 = vmatprep.subr.msk.mxu0 %vm336_vm0, %v6522_v44  ;;  %7691 = vst [vmem:[#allocation27_spill] sm:$0xff] %v6657_v10 }
  0x42   : > { %5446 = vmatmul.mubr.msk.f32.gmra.mrb[18].mxu1 %vm239_vm1, %v6533_v45 }
  0x43   : > { %5672 = vmatmul.mubr.msk.f32.gmra.mrb[2].mxu0 %vm239_vm1, %v6536_v46  ;;  %5448 = vmatprep.mubr.msk.f32.mxu1 %vm239_vm1, %v6541_v47 }
  0x44   : > { %5674 = vmatprep.mubr.msk.f32.mxu0 %vm239_vm1, %v6544_v48 }
  0x46   : > { %5449 = vmatmul.mubr.msk.f32.gmra.mrb[20].mxu1 %vm239_vm1, %v6557_v49 }
  0x47   : > { %5675 = vmatmul.mubr.msk.f32.gmra.mrb[4].mxu0 %vm239_vm1, %v6560_v50  ;;  %5451 = vmatprep.mubr.msk.f32.mxu1 %vm239_vm1, %v6563_v51 }
  0x48   : > { %5677 = vmatprep.mubr.msk.f32.mxu0 %vm239_vm1, %v6566_v52 }
  0x4a   : > { %5452 = vmatmul.mubr.msk.f32.gmra.mrb[22].mxu1 %vm239_vm1, %v6577_v53 }
  0x4b   : > { %5678 = vmatmul.mubr.msk.f32.gmra.mrb[6].mxu0 %vm239_vm1, %v6580_v54  ;;  %5454 = vmatprep.mubr.msk.f32.mxu1 %vm239_vm1, %v6583_v55 }
  0x4c   : > { %5680 = vmatprep.mubr.msk.f32.mxu0 %vm239_vm1, %v6586_v56 }
  0x4e   : > { %5455 = vmatmul.mubr.msk.f32.gmra.mrb[24].mxu1 %vm239_vm1, %v6597_v57 }
  0x4f   : > { %5681 = vmatmul.mubr.msk.f32.gmra.mrb[8].mxu0 %vm239_vm1, %v6600_v58  ;;  %5457 = vmatprep.mubr.msk.f32.mxu1 %vm239_vm1, %v6603_v59 }
  0x50   : > { %5683 = vmatprep.mubr.msk.f32.mxu0 %vm239_vm1, %v6606_v60  ;;  %v6683_v60 = vld [vmem:[%s7616_s1 + $0xc] sm:$0xf] }
  0x52   : > { %5458 = vmatmul.mubr.msk.f32.gmra.mrb[26].mxu1 %vm239_vm1, %v6617_v61 }
  0x53   : > { %5684 = vmatmul.mubr.msk.f32.gmra.mrb[10].mxu0 %vm239_vm1, %v6620_v62  ;;  %5460 = vmatprep.mubr.msk.f32.mxu1 %vm239_vm1, %v6623_v63  ;;  %v6678_v62 = vld [vmem:[%s6325_s5 + $0xf2] sm:$0xff] }
  0x54   : > { %5686 = vmatprep.mubr.msk.f32.mxu0 %vm239_vm1, %v6626_v0  ;;  %v6664_v0 = vld [vmem:[%s6325_s5 + $0xda] sm:$0xff] }
  0x55   : > { %7692 = vst [vmem:[#allocation28_spill] sm:$0xff] %v6664_v0 }
  0x56   : > { %5461 = vmatmul.mubr.msk.f32.gmra.mrb[28].mxu1 %vm239_vm1, %v6637_v2 }
  0x57   : > { %5687 = vmatmul.mubr.msk.f32.gmra.mrb[12].mxu0 %vm239_vm1, %v6640_v3  ;;  %5463 = vmatprep.mubr.msk.f32.mxu1 %vm239_vm1, %v6643_v4  ;;  %v6675_v3 = vld [vmem:[%s6325_s5 + $0xe2] sm:$0xff] }
  0x58   : > { %5689 = vmatprep.mubr.msk.f32.mxu0 %vm239_vm1, %v6646_v6  ;;  %v630_v6 = vld [vmem:[%s6325_s5 + $0x9] sm:$0xff] }
  0x5a   : > { %5464 = vmatmul.mubr.msk.f32.gmra.mrb[30].mxu1 %vm239_vm1, %v6657_v10 }
  0x5b   : > { %5690 = vmatmul.mubr.msk.f32.gmra.mrb[14].mxu0 %vm239_vm1, %v6660_v12  ;;  %5468 = vmatprep.mubr.msk.f32.mxu1 %vm239_vm1, %v629_v8  ;;  %v6693_v8 = vld [vmem:[%s6325_s5 + $0xfa] sm:$0xff] }
  0x5c   : > { %5692 = vmatprep.mubr.msk.f32.mxu0 %vm239_vm1, %v6664_v0  ;;  %v6698_v0 = vld [vmem:[%s6325_s5 + $0x10a] sm:$0xff] }
  0x5e   : > { %5469 = vmatmul.mubr.msk.f32.vlgmr.msra.gmra.mrb[0].mxu1 %vm239_vm1, %v630_v6  ;;  %v6728_v6 = vld [vmem:[%s6325_s5 + $0x13a] sm:$0xff] }
  0x5f   : > { %5693 = vmatmul.mubr.msk.f32.gmra.mrb[16].mxu0 %vm239_vm1, %v6675_v3  ;;  %5517 = vmatpush3.msk.msra.mxu1 %vm336_vm0, %v6355_v11  ;;  %v6714_v11 = vld [vmem:[%s6325_s5 + $0x122] sm:$0xff]  ;;  %7696 = vst [vmem:[#allocation32_spill] sm:$0xff] %v6728_v6 }
  0x60   : > { %5471 = vmatprep.mubr.msk.f32.mxu1 %vm239_vm1, %v6329_v5  ;;  %5695 = vmatprep.mubr.msk.f32.mxu0 %vm239_vm1, %v6678_v62  ;;  %v6711_v5 = vld [vmem:[%s6325_s5 + $0x112] sm:$0xff]  ;;  %7694 = vst [vmem:[#allocation30_spill] sm:$0xff] %v6714_v11 }
  0x61   : > { %5566 = vmatprep.subr.msk.mxu1 %vm336_vm0, %v6683_v60  ;;  %7693 = vst [vmem:[#allocation29_spill] sm:$0xff] %v6711_v5 }
  0x62   : > { %5472 = vmatmul.mubr.msk.f32.gmra.mrb[2].mxu1 %vm239_vm1, %v6336_v7  ;;  %v6725_v7 = vld [vmem:[%s6325_s5 + $0x12a] sm:$0xff] }
  0x63   : > { %5696 = vmatmul.mubr.msk.f32.gmra.mrb[18].mxu0 %vm239_vm1, %v6693_v8  ;;  %5474 = vmatprep.mubr.msk.f32.mxu1 %vm239_vm1, %v6342_v9  ;;  %7695 = vst [vmem:[#allocation31_spill] sm:$0xff] %v6725_v7 }
  0x64   : > { %5698 = vmatprep.mubr.msk.f32.mxu0 %vm239_vm1, %v6698_v0 }
  0x66   : > { %5475 = vmatmul.mubr.msk.f32.gmra.mrb[4].mxu1 %vm239_vm1, %v6363_v13 }
  0x67   : > { %5699 = vmatmul.mubr.msk.f32.gmra.mrb[20].mxu0 %vm239_vm1, %v6711_v5  ;;  %5477 = vmatprep.mubr.msk.f32.mxu1 %vm239_vm1, %v6373_v15  ;;  %v6739_v5 = vld [vmem:[%s6325_s5 + $0x142] sm:$0xff] }
  0x68   : > { %5701 = vmatprep.mubr.msk.f32.mxu0 %vm239_vm1, %v6714_v11  ;;  %7697 = vst [vmem:[#allocation33_spill] sm:$0xff] %v6739_v5  ;;  %v6742_v11 = vld [vmem:[%s6325_s5 + $0x152] sm:$0xff] }
  0x69   : > { %7698 = vst [vmem:[#allocation34_spill] sm:$0xff] %v6742_v11 }
  0x6a   : > { %5478 = vmatmul.mubr.msk.f32.gmra.mrb[6].mxu1 %vm239_vm1, %v6391_v17 }
  0x6b   : > { %5702 = vmatmul.mubr.msk.f32.gmra.mrb[22].mxu0 %vm239_vm1, %v6725_v7  ;;  %5480 = vmatprep.mubr.msk.f32.mxu1 %vm239_vm1, %v6397_v19  ;;  %v6753_v7 = vld [vmem:[%s6325_s5 + $0x15a] sm:$0xff] }
  0x6c   : > { %5704 = vmatprep.mubr.msk.f32.mxu0 %vm239_vm1, %v6728_v6  ;;  %7699 = vst [vmem:[#allocation35_spill] sm:$0xff] %v6753_v7  ;;  %v6756_v6 = vld [vmem:[%s6325_s5 + $0x16a] sm:$0xff] }
  0x6e   : > { %5481 = vmatmul.mubr.msk.f32.gmra.mrb[8].mxu1 %vm239_vm1, %v6411_v21 }
  0x6f   : > { %5705 = vmatmul.mubr.msk.f32.gmra.mrb[24].mxu0 %vm239_vm1, %v6739_v5  ;;  %5483 = vmatprep.mubr.msk.f32.mxu1 %vm239_vm1, %v6417_v23  ;;  %v6767_v5 = vld [vmem:[%s6325_s5 + $0x172] sm:$0xff] }
  0x70   : > { %5707 = vmatprep.mubr.msk.f32.mxu0 %vm239_vm1, %v6742_v11  ;;  %7700 = vst [vmem:[#allocation36_spill] sm:$0xff] %v6767_v5  ;;  %v6770_v11 = vld [vmem:[%s6325_s5 + $0x182] sm:$0xff] }
  0x71   : > { %7701 = vst [vmem:[#allocation37_spill] sm:$0xff] %v6770_v11 }
  0x72   : > { %5484 = vmatmul.mubr.msk.f32.gmra.mrb[10].mxu1 %vm239_vm1, %v6431_v25 }
  0x73   : > { %5708 = vmatmul.mubr.msk.f32.gmra.mrb[26].mxu0 %vm239_vm1, %v6753_v7  ;;  %5486 = vmatprep.mubr.msk.f32.mxu1 %vm239_vm1, %v6437_v27  ;;  %v6781_v7 = vld [vmem:[%s6325_s5 + $0x18a] sm:$0xff] }
  0x74   : > { %5710 = vmatprep.mubr.msk.f32.mxu0 %vm239_vm1, %v6756_v6  ;;  %7702 = vst [vmem:[#allocation38_spill] sm:$0xff] %v6781_v7 }
  0x76   : > { %5487 = vmatmul.mubr.msk.f32.gmra.mrb[12].mxu1 %vm239_vm1, %v6451_v29 }
  0x77   : > { %5711 = vmatmul.mubr.msk.f32.gmra.mrb[28].mxu0 %vm239_vm1, %v6767_v5  ;;  %5489 = vmatprep.mubr.msk.f32.mxu1 %vm239_vm1, %v6457_v31  ;;  %v6792_v5 = vld [vmem:[%s6325_s5 + $0xd9] sm:$0xff] }
  0x78   : > { %5713 = vmatprep.mubr.msk.f32.mxu0 %vm239_vm1, %v6770_v11  ;;  %v6797_v11 = vld [vmem:[%s7616_s1 + $0x20] sm:$0xf] }
  0x7a   : > { %5490 = vmatmul.mubr.msk.f32.gmra.mrb[14].mxu1 %vm239_vm1, %v6471_v33 }
  0x7b   : > { %5714 = vmatmul.mubr.msk.f32.gmra.mrb[30].mxu0 %vm239_vm1, %v6781_v7  ;;  %5492 = vmatprep.mubr.msk.f32.mxu1 %vm239_vm1, %v6477_v35  ;;  %v6808_v7 = vld [vmem:[%s6325_s5 + $0xe1] sm:$0xff] }
  0x7c   : > { %5718 = vmatprep.mubr.msk.f32.mxu0 %vm239_vm1, %v6370_v14  ;;  %v6813_v14 = vld [vmem:[%s6325_s5 + $0xf1] sm:$0xff] }
  0x7e   : > { %5493 = vmatmul.mubr.msk.f32.gmra.mrb[16].mxu1 %vm239_vm1, %v6491_v37 }
  0x7f   : > { %5719 = vmatmul.mubr.msk.f32.vlgmr.msra.gmra.mrb[0].mxu0 %vm239_vm1, %v6388_v16  ;;  %5495 = vmatprep.mubr.msk.f32.mxu1 %vm239_vm1, %v6792_v5 }
  0x80   : > { %5767 = vmatpush3.msk.msra.mxu0 %vm336_vm0, %v6522_v44  ;;  %5721 = vmatprep.mubr.msk.f32.mxu0 %vm239_vm1, %v6394_v18  ;;  %v6826_v44 = vld [vmem:[%s6325_s5 + $0xf9] sm:$0xff]  ;;  %v6829_v18 = vld [vmem:[%s6325_s5 + $0x109] sm:$0xff] }
  0x81   : > { %5816 = vmatprep.subr.msk.mxu0 %vm336_vm0, %v6797_v11 }
  0x82   : > { %5496 = vmatmul.mubr.msk.f32.gmra.mrb[18].mxu1 %vm239_vm1, %v6808_v7 }
  0x83   : > { %5722 = vmatmul.mubr.msk.f32.gmra.mrb[2].mxu0 %vm239_vm1, %v6408_v20  ;;  %5498 = vmatprep.mubr.msk.f32.mxu1 %vm239_vm1, %v6813_v14  ;;  %v6840_v20 = vld [vmem:[%s6325_s5 + $0x111] sm:$0xff] }
  0x84   : > { %5724 = vmatprep.mubr.msk.f32.mxu0 %vm239_vm1, %v6414_v22  ;;  %v6843_v22 = vld [vmem:[%s6325_s5 + $0x121] sm:$0xff] }
  0x86   : > { %5499 = vmatmul.mubr.msk.f32.gmra.mrb[20].mxu1 %vm239_vm1, %v6826_v44 }
  0x87   : > { %5725 = vmatmul.mubr.msk.f32.gmra.mrb[4].mxu0 %vm239_vm1, %v6428_v24  ;;  %5501 = vmatprep.mubr.msk.f32.mxu1 %vm239_vm1, %v6829_v18  ;;  %v6854_v24 = vld [vmem:[%s6325_s5 + $0x129] sm:$0xff] }
  0x88   : > { %5727 = vmatprep.mubr.msk.f32.mxu0 %vm239_vm1, %v6434_v26  ;;  %v6857_v26 = vld [vmem:[%s6325_s5 + $0x139] sm:$0xff] }
  0x8a   : > { %5502 = vmatmul.mubr.msk.f32.gmra.mrb[22].mxu1 %vm239_vm1, %v6840_v20 }
  0x8b   : > { %5728 = vmatmul.mubr.msk.f32.gmra.mrb[6].mxu0 %vm239_vm1, %v6448_v28  ;;  %5504 = vmatprep.mubr.msk.f32.mxu1 %vm239_vm1, %v6843_v22  ;;  %v6868_v28 = vld [vmem:[%s6325_s5 + $0x141] sm:$0xff] }
  0x8c   : > { %5730 = vmatprep.mubr.msk.f32.mxu0 %vm239_vm1, %v6454_v30  ;;  %v6871_v30 = vld [vmem:[%s6325_s5 + $0x151] sm:$0xff] }
  0x8d   : > { %7703 = vst [vmem:[#allocation39_spill] sm:$0xff] %v6871_v30 }
  0x8e   : > { %5505 = vmatmul.mubr.msk.f32.gmra.mrb[24].mxu1 %vm239_vm1, %v6854_v24 }
  0x8f   : > { %5731 = vmatmul.mubr.msk.f32.gmra.mrb[8].mxu0 %vm239_vm1, %v6468_v32  ;;  %5507 = vmatprep.mubr.msk.f32.mxu1 %vm239_vm1, %v6857_v26  ;;  %v6882_v32 = vld [vmem:[%s6325_s5 + $0x159] sm:$0xff] }
  0x90   : > { %5733 = vmatprep.mubr.msk.f32.mxu0 %vm239_vm1, %v6474_v34  ;;  %v6885_v34 = vld [vmem:[%s6325_s5 + $0x169] sm:$0xff] }
  0x92   : > { %5508 = vmatmul.mubr.msk.f32.gmra.mrb[26].mxu1 %vm239_vm1, %v6868_v28 }
  0x93   : > { %5734 = vmatmul.mubr.msk.f32.gmra.mrb[10].mxu0 %vm239_vm1, %v6488_v36  ;;  %5510 = vmatprep.mubr.msk.f32.mxu1 %vm239_vm1, %v6871_v30  ;;  %v6896_v36 = vld [vmem:[%s6325_s5 + $0x171] sm:$0xff]  ;;  %v1083_v30 = vld [vmem:[%s6325_s5 + $0x2] sm:$0xff] }
  0x94   : > { %5736 = vmatprep.mubr.msk.f32.mxu0 %vm239_vm1, %v6494_v38 }
  0x96   : > { %5511 = vmatmul.mubr.msk.f32.gmra.mrb[28].mxu1 %vm239_vm1, %v6882_v32 }
  0x97   : > { %5737 = vmatmul.mubr.msk.f32.gmra.mrb[12].mxu0 %vm239_vm1, %v6508_v40  ;;  %5513 = vmatprep.mubr.msk.f32.mxu1 %vm239_vm1, %v6885_v34  ;;  %v1084_v40 = vld [vmem:[%s6325_s5 + $0xa] sm:$0xff] }
  0x98   : > { %5739 = vmatprep.mubr.msk.f32.mxu0 %vm239_vm1, %v6514_v42 }
  0x9a   : > { %5514 = vmatmul.mubr.msk.f32.gmra.mrb[30].mxu1 %vm239_vm1, %v6896_v36 }
  0x9b   : > { %5740 = vmatmul.mubr.msk.f32.gmra.mrb[14].mxu0 %vm239_vm1, %v6533_v45  ;;  %5518 = vmatprep.mubr.msk.f32.mxu1 %vm239_vm1, %v1083_v30  ;;  %v6951_v30 = vld [vmem:[%s6325_s5 + $0x180] sm:$0xff] }
  0x9c   : > { %5742 = vmatprep.mubr.msk.f32.mxu0 %vm239_vm1, %v6541_v47  ;;  %7704 = vst [vmem:[#allocation40_spill] sm:$0xff] %v6951_v30 }
  0x9e   : > { %5519 = vmatmul.mubr.msk.f32.vlgmr.msra.gmra.mrb[0].mxu1 %vm239_vm1, %v1084_v40  ;;  %v6962_v40 = vld [vmem:[%s6325_s5 + $0x188] sm:$0xff] }
  0x9f   : > { %5743 = vmatmul.mubr.msk.f32.gmra.mrb[16].mxu0 %vm239_vm1, %v6557_v49  ;;  %5567 = vmatpush3.msk.msra.mxu1 %vm336_vm0, %v6683_v60  ;;  %v7706_v60 = vld [vmem:[#allocation21_spill] sm:$0xff] }
  0xa0   : > { %5521 = vmatprep.mubr.msk.f32.mxu1 %vm239_vm1, %v6497_v39  ;;  %5745 = vmatprep.mubr.msk.f32.mxu0 %vm239_vm1, %v6563_v51  ;;  %v7705_v39 = vld [vmem:[#allocation20_spill] sm:$0xff] }
  0xa1   : > { %5866 = vmatprep.subr.msk.mxu1 %vm336_vm0, %v6304_v1 }
  0xa2   : > { %5522 = vmatmul.mubr.msk.f32.gmra.mrb[2].mxu1 %vm239_vm1, %v6511_v41  ;;  %v4945_v41 = vld [vmem:[%s6325_s5 + $0x198] sm:$0xff] }
  0xa3   : > { %5746 = vmatmul.mubr.msk.f32.gmra.mrb[18].mxu0 %vm239_vm1, %v6577_v53  ;;  %5524 = vmatprep.mubr.msk.f32.mxu1 %vm239_vm1, %v6517_v43 }
  0xa4   : > { %5748 = vmatprep.mubr.msk.f32.mxu0 %vm239_vm1, %v6583_v55 }
  0xa6   : > { %5525 = vmatmul.mubr.msk.f32.gmra.mrb[4].mxu1 %vm239_vm1, %v6536_v46 }
  0xa7   : > { %5749 = vmatmul.mubr.msk.f32.gmra.mrb[20].mxu0 %vm239_vm1, %v6597_v57  ;;  %5527 = vmatprep.mubr.msk.f32.mxu1 %vm239_vm1, %v6544_v48 }
  0xa8   : > { %5751 = vmatprep.mubr.msk.f32.mxu0 %vm239_vm1, %v6603_v59 }
  0xaa   : > { %5528 = vmatmul.mubr.msk.f32.gmra.mrb[6].mxu1 %vm239_vm1, %v6560_v50 }
  0xab   : > { %5752 = vmatmul.mubr.msk.f32.gmra.mrb[22].mxu0 %vm239_vm1, %v6617_v61  ;;  %5530 = vmatprep.mubr.msk.f32.mxu1 %vm239_vm1, %v6566_v52 }
  0xac   : > { %5754 = vmatprep.mubr.msk.f32.mxu0 %vm239_vm1, %v6623_v63 }
  0xae   : > { %5531 = vmatmul.mubr.msk.f32.gmra.mrb[8].mxu1 %vm239_vm1, %v6580_v54 }
  0xaf   : > { %5755 = vmatmul.mubr.msk.f32.gmra.mrb[24].mxu0 %vm239_vm1, %v6637_v2  ;;  %5533 = vmatprep.mubr.msk.f32.mxu1 %vm239_vm1, %v6586_v56  ;;  %v7708_v2 = vld [vmem:[#allocation24_spill] sm:$0xff] }
  0xb0   : > { %5757 = vmatprep.mubr.msk.f32.mxu0 %vm239_vm1, %v6643_v4  ;;  %v7707_v4 = vld [vmem:[#allocation22_spill] sm:$0xff] }
  0xb2   : > { %5534 = vmatmul.mubr.msk.f32.gmra.mrb[10].mxu1 %vm239_vm1, %v6600_v58 }
  0xb3   : > { %5758 = vmatmul.mubr.msk.f32.gmra.mrb[26].mxu0 %vm239_vm1, %v6657_v10  ;;  %5536 = vmatprep.mubr.msk.f32.mxu1 %vm239_vm1, %v7705_v39  ;;  %v4946_v10 = vld [vmem:[%s6325_s5 + $0x1a0] sm:$0xff] }
  0xb4   : > { %5760 = vmatprep.mubr.msk.f32.mxu0 %vm239_vm1, %v6951_v30  ;;  %v7709_v30 = vld [vmem:[#allocation26_spill] sm:$0xff] }
  0xb6   : > { %5537 = vmatmul.mubr.msk.f32.gmra.mrb[12].mxu1 %vm239_vm1, %v7706_v60 }
  0xb7   : > { %5761 = vmatmul.mubr.msk.f32.gmra.mrb[28].mxu0 %vm239_vm1, %v6962_v40  ;;  %5539 = vmatprep.mubr.msk.f32.mxu1 %vm239_vm1, %v7707_v4 }
  0xb8   : > { %5763 = vmatprep.mubr.msk.f32.mxu0 %vm239_vm1, %v4945_v41  ;;  %v7710_v41 = vld [vmem:[#allocation28_spill] sm:$0xff] }
  0xba   : > { %5540 = vmatmul.mubr.msk.f32.gmra.mrb[14].mxu1 %vm239_vm1, %v7708_v2 }
  0xbb   : > { %5764 = vmatmul.mubr.msk.f32.gmra.mrb[30].mxu0 %vm239_vm1, %v4946_v10  ;;  %5542 = vmatprep.mubr.msk.f32.mxu1 %vm239_vm1, %v7709_v30  ;;  %v7727_v10 = vld [vmem:[#allocation39_spill] sm:$0xff] }
  0xbc   : > { %5768 = vmatprep.mubr.msk.f32.mxu0 %vm239_vm1, %v6342_v9  ;;  %v7711_v9 = vld [vmem:[#allocation29_spill] sm:$0xff] }
  0xbe   : > { %5543 = vmatmul.mubr.msk.f32.gmra.mrb[16].mxu1 %vm239_vm1, %v6660_v12 }
  0xbf   : > { %5769 = vmatmul.mubr.msk.f32.vlgmr.msra.gmra.mrb[0].mxu0 %vm239_vm1, %v6363_v13  ;;  %5545 = vmatprep.mubr.msk.f32.mxu1 %vm239_vm1, %v7710_v41  ;;  %v7712_v13 = vld [vmem:[#allocation30_spill] sm:$0xff] }
  0xc0   : > { %5817 = vmatpush3.msk.msra.mxu0 %vm336_vm0, %v6797_v11  ;;  %5771 = vmatprep.mubr.msk.f32.mxu0 %vm239_vm1, %v6373_v15  ;;  %v7713_v15 = vld [vmem:[#allocation31_spill] sm:$0xff]  ;;  %v7728_v11 = vld [vmem:[#allocation14_spill] sm:$0xff] }
  0xc2   : > { %5546 = vmatmul.mubr.msk.f32.gmra.mrb[18].mxu1 %vm239_vm1, %v6675_v3 }
  0xc3   : > { %5772 = vmatmul.mubr.msk.f32.gmra.mrb[2].mxu0 %vm239_vm1, %v6391_v17  ;;  %5548 = vmatprep.mubr.msk.f32.mxu1 %vm239_vm1, %v6678_v62  ;;  %v7714_v17 = vld [vmem:[#allocation32_spill] sm:$0xff] }
  0xc4   : > { %5774 = vmatprep.mubr.msk.f32.mxu0 %vm239_vm1, %v6397_v19  ;;  %v7715_v19 = vld [vmem:[#allocation33_spill] sm:$0xff] }
  0xc6   : > { %5549 = vmatmul.mubr.msk.f32.gmra.mrb[20].mxu1 %vm239_vm1, %v6693_v8 }
  0xc7   : > { %5775 = vmatmul.mubr.msk.f32.gmra.mrb[4].mxu0 %vm239_vm1, %v6411_v21  ;;  %5551 = vmatprep.mubr.msk.f32.mxu1 %vm239_vm1, %v6698_v0  ;;  %v7716_v21 = vld [vmem:[#allocation34_spill] sm:$0xff] }
  0xc8   : > { %5777 = vmatprep.mubr.msk.f32.mxu0 %vm239_vm1, %v6417_v23  ;;  %v7717_v23 = vld [vmem:[#allocation35_spill] sm:$0xff] }
  0xca   : > { %5552 = vmatmul.mubr.msk.f32.gmra.mrb[22].mxu1 %vm239_vm1, %v7711_v9 }
  0xcb   : > { %5778 = vmatmul.mubr.msk.f32.gmra.mrb[6].mxu0 %vm239_vm1, %v6431_v25  ;;  %5554 = vmatprep.mubr.msk.f32.mxu1 %vm239_vm1, %v7712_v13  ;;  %v7718_v25 = vld [vmem:[#allocation36_spill] sm:$0xff] }
  0xcc   : > { %5780 = vmatprep.mubr.msk.f32.mxu0 %vm239_vm1, %v6437_v27  ;;  %v7719_v27 = vld [vmem:[#allocation6_spill] sm:$0xff] }
  0xce   : > { %5555 = vmatmul.mubr.msk.f32.gmra.mrb[24].mxu1 %vm239_vm1, %v7713_v15 }
  0xcf   : > { %5781 = vmatmul.mubr.msk.f32.gmra.mrb[8].mxu0 %vm239_vm1, %v6451_v29  ;;  %5557 = vmatprep.mubr.msk.f32.mxu1 %vm239_vm1, %v7714_v17  ;;  %v7720_v29 = vld [vmem:[#allocation7_spill] sm:$0xff] }
  0xd0   : > { %5783 = vmatprep.mubr.msk.f32.mxu0 %vm239_vm1, %v6457_v31  ;;  %v7721_v31 = vld [vmem:[#allocation8_spill] sm:$0xff] }
  0xd2   : > { %5558 = vmatmul.mubr.msk.f32.gmra.mrb[26].mxu1 %vm239_vm1, %v7715_v19 }
  0xd3   : > { %5784 = vmatmul.mubr.msk.f32.gmra.mrb[10].mxu0 %vm239_vm1, %v6471_v33  ;;  %5560 = vmatprep.mubr.msk.f32.mxu1 %vm239_vm1, %v7716_v21  ;;  %v7722_v33 = vld [vmem:[#allocation9_spill] sm:$0xff] }
  0xd4   : > { %5786 = vmatprep.mubr.msk.f32.mxu0 %vm239_vm1, %v6477_v35  ;;  %v7724_v35 = vld [vmem:[#allocation11_spill] sm:$0xff] }
  0xd6   : > { %5561 = vmatmul.mubr.msk.f32.gmra.mrb[28].mxu1 %vm239_vm1, %v7717_v23 }
  0xd7   : > { %5787 = vmatmul.mubr.msk.f32.gmra.mrb[12].mxu0 %vm239_vm1, %v6491_v37  ;;  %5563 = vmatprep.mubr.msk.f32.mxu1 %vm239_vm1, %v6756_v6  ;;  %v7726_v37 = vld [vmem:[#allocation13_spill] sm:$0xff] }
  0xd8   : > { %5789 = vmatprep.mubr.msk.f32.mxu0 %vm239_vm1, %v6792_v5 }
  0xda   : > { %5564 = vmatmul.mubr.msk.f32.gmra.mrb[30].mxu1 %vm239_vm1, %v7718_v25 }
  0xdb   : > { %5790 = vmatmul.mubr.msk.f32.gmra.mrb[14].mxu0 %vm239_vm1, %v6808_v7  ;;  %5568 = vmatprep.mubr.msk.f32.mxu1 %vm239_vm1, %v7719_v27  ;;  %v7729_v27 = vld [vmem:[#allocation15_spill] sm:$0xff] }
  0xdc   : > { %5792 = vmatprep.mubr.msk.f32.mxu0 %vm239_vm1, %v6813_v14 }
  0xde   : > { %5569 = vmatmul.mubr.msk.f32.vlgmr.msra.gmra.mrb[0].mxu1 %vm239_vm1, %v7720_v29  ;;  %v7089_v29 = vld [vmem:[%s6325_s5 + $0x181] sm:$0xff] }
  0xdf   : > { %5793 = vmatmul.mubr.msk.f32.gmra.mrb[16].mxu0 %vm239_vm1, %v6826_v44  ;;  %5867 = vmatpush3.msk.msra.mxu1 %vm336_vm0, %v6304_v1  ;;  %v7723_v1 = vld [vmem:[#allocation10_spill] sm:$0xff] }
  0xe0   : > { %5571 = vmatprep.mubr.msk.f32.mxu1 %vm239_vm1, %v7721_v31  ;;  %5795 = vmatprep.mubr.msk.f32.mxu0 %vm239_vm1, %v6829_v18  ;;  %v7730_v31 = vld [vmem:[#allocation16_spill] sm:$0xff] }
  0xe2   : > { %5572 = vmatmul.mubr.msk.f32.gmra.mrb[2].mxu1 %vm239_vm1, %v6388_v16  ;;  %v7725_v16 = vld [vmem:[#allocation12_spill] sm:$0xff] }
  0xe3   : > { %5796 = vmatmul.mubr.msk.f32.gmra.mrb[18].mxu0 %vm239_vm1, %v6840_v20  ;;  %5574 = vmatprep.mubr.msk.f32.mxu1 %vm239_vm1, %v7722_v33  ;;  %v7731_v33 = vld [vmem:[#allocation17_spill] sm:$0xff] }
  0xe4   : > { %5798 = vmatprep.mubr.msk.f32.mxu0 %vm239_vm1, %v6843_v22 }
  0xe6   : > { %5575 = vmatmul.mubr.msk.f32.gmra.mrb[4].mxu1 %vm239_vm1, %v7723_v1  ;;  %v7100_v1 = vld [vmem:[%s6325_s5 + $0x189] sm:$0xff] }
  0xe7   : > { %5799 = vmatmul.mubr.msk.f32.gmra.mrb[20].mxu0 %vm239_vm1, %v6854_v24  ;;  %5577 = vmatprep.mubr.msk.f32.mxu1 %vm239_vm1, %v7724_v35  ;;  %v5011_v35 = vld [vmem:[%s6325_s5 + $0x199] sm:$0xff] }
  0xe8   : > { %5801 = vmatprep.mubr.msk.f32.mxu0 %vm239_vm1, %v6857_v26 }
  0xea   : > { %5578 = vmatmul.mubr.msk.f32.gmra.mrb[6].mxu1 %vm239_vm1, %v7725_v16  ;;  %v7732_v16 = vld [vmem:[#allocation18_spill] sm:$0xff] }
  0xeb   : > { %5802 = vmatmul.mubr.msk.f32.gmra.mrb[22].mxu0 %vm239_vm1, %v6868_v28  ;;  %5580 = vmatprep.mubr.msk.f32.mxu1 %vm239_vm1, %v7726_v37  ;;  %v5012_v37 = vld [vmem:[%s6325_s5 + $0x1a1] sm:$0xff] }
  0xec   : > { %5804 = vmatprep.mubr.msk.f32.mxu0 %vm239_vm1, %v7727_v10 }
  0xee   : > { %5581 = vmatmul.mubr.msk.f32.gmra.mrb[8].mxu1 %vm239_vm1, %v7728_v11  ;;  %v7733_v11 = vld [vmem:[#allocation19_spill] sm:$0xff] }
  0xef   : > { %5805 = vmatmul.mubr.msk.f32.gmra.mrb[24].mxu0 %vm239_vm1, %v6882_v32  ;;  %5583 = vmatprep.mubr.msk.f32.mxu1 %vm239_vm1, %v7729_v27 }
  0xf0   : > { %5807 = vmatprep.mubr.msk.f32.mxu0 %vm239_vm1, %v6885_v34 }
  0xf2   : > { %5584 = vmatmul.mubr.msk.f32.gmra.mrb[10].mxu1 %vm239_vm1, %v7730_v31 }
  0xf3   : > { %5808 = vmatmul.mubr.msk.f32.gmra.mrb[26].mxu0 %vm239_vm1, %v6896_v36  ;;  %5586 = vmatprep.mubr.msk.f32.mxu1 %vm239_vm1, %v7731_v33 }
  0xf4   : > { %5810 = vmatprep.mubr.msk.f32.mxu0 %vm239_vm1, %v7089_v29 }
  0xf6   : > { %5587 = vmatmul.mubr.msk.f32.gmra.mrb[12].mxu1 %vm239_vm1, %v7732_v16 }
  0xf7   : > { %5811 = vmatmul.mubr.msk.f32.gmra.mrb[28].mxu0 %vm239_vm1, %v7100_v1  ;;  %5589 = vmatprep.mubr.msk.f32.mxu1 %vm239_vm1, %v6494_v38  ;;  %v7734_v38 = vld [vmem:[#allocation23_spill] sm:$0xff] }
  0xf8   : > { %5813 = vmatprep.mubr.msk.f32.mxu0 %vm239_vm1, %v5011_v35 }
  0xfa   : > { %5590 = vmatmul.mubr.msk.f32.gmra.mrb[14].mxu1 %vm239_vm1, %v7733_v11 }
  0xfb   : > { %5814 = vmatmul.mubr.msk.f32.gmra.mrb[30].mxu0 %vm239_vm1, %v5012_v37  ;;  %5592 = vmatprep.mubr.msk.f32.mxu1 %vm239_vm1, %v6514_v42  ;;  %v7735_v42 = vld [vmem:[#allocation25_spill] sm:$0xff] }
  0xfc   : > { %5818 = vmatprep.mubr.msk.f32.mxu0 %vm239_vm1, %v6517_v43  ;;  %v7736_v43 = vld [vmem:[#allocation27_spill] sm:$0xff] }
  0xfe   : > { %5593 = vmatmul.mubr.msk.f32.gmra.mrb[16].mxu1 %vm239_vm1, %v6533_v45  ;;  %v7737_v45 = vld [vmem:[#allocation40_spill] sm:$0xff] }
  0xff   : > { %5819 = vmatmul.mubr.msk.f32.vlgmr.msra.gmra.mrb[0].mxu0 %vm239_vm1, %v6536_v46  ;;  %5595 = vmatprep.mubr.msk.f32.mxu1 %vm239_vm1, %v6541_v47 }
 0x100   : > { %5821 = vmatprep.mubr.msk.f32.mxu0 %vm239_vm1, %v6544_v48 }
 0x102   : > { %5596 = vmatmul.mubr.msk.f32.gmra.mrb[18].mxu1 %vm239_vm1, %v6557_v49 }
 0x103   : > { %5822 = vmatmul.mubr.msk.f32.gmra.mrb[2].mxu0 %vm239_vm1, %v6560_v50  ;;  %5598 = vmatprep.mubr.msk.f32.mxu1 %vm239_vm1, %v6563_v51 }
 0x104   : > { %5824 = vmatprep.mubr.msk.f32.mxu0 %vm239_vm1, %v6566_v52 }
 0x106   : > { %5599 = vmatmul.mubr.msk.f32.gmra.mrb[20].mxu1 %vm239_vm1, %v6577_v53 }
 0x107   : > { %5825 = vmatmul.mubr.msk.f32.gmra.mrb[4].mxu0 %vm239_vm1, %v6580_v54  ;;  %5601 = vmatprep.mubr.msk.f32.mxu1 %vm239_vm1, %v6583_v55 }
 0x108   : > { %5827 = vmatprep.mubr.msk.f32.mxu0 %vm239_vm1, %v6586_v56 }
 0x10a   : > { %5602 = vmatmul.mubr.msk.f32.gmra.mrb[22].mxu1 %vm239_vm1, %v6597_v57 }
 0x10b   : > { %5828 = vmatmul.mubr.msk.f32.gmra.mrb[6].mxu0 %vm239_vm1, %v6600_v58  ;;  %5604 = vmatprep.mubr.msk.f32.mxu1 %vm239_vm1, %v6603_v59 }
 0x10c   : > { %5830 = vmatprep.mubr.msk.f32.mxu0 %vm239_vm1, %v7705_v39 }
 0x10e   : > { %5605 = vmatmul.mubr.msk.f32.gmra.mrb[24].mxu1 %vm239_vm1, %v6617_v61 }
 0x10f   : > { %5831 = vmatmul.mubr.msk.f32.gmra.mrb[8].mxu0 %vm239_vm1, %v7706_v60  ;;  %5607 = vmatprep.mubr.msk.f32.mxu1 %vm239_vm1, %v6623_v63 }
 0x110   : > { %5833 = vmatprep.mubr.msk.f32.mxu0 %vm239_vm1, %v7707_v4 }
 0x112   : > { %5608 = vmatmul.mubr.msk.f32.gmra.mrb[26].mxu1 %vm239_vm1, %v7734_v38 }
 0x113   : > { %5834 = vmatmul.mubr.msk.f32.gmra.mrb[10].mxu0 %vm239_vm1, %v7708_v2  ;;  %5610 = vmatprep.mubr.msk.f32.mxu1 %vm239_vm1, %v7735_v42 }
 0x114   : > { %5836 = vmatprep.mubr.msk.f32.mxu0 %vm239_vm1, %v7709_v30 }
 0x116   : > { %5611 = vmatmul.mubr.msk.f32.gmra.mrb[28].mxu1 %vm239_vm1, %v7736_v43 }
 0x117   : > { %5837 = vmatmul.mubr.msk.f32.gmra.mrb[12].mxu0 %vm239_vm1, %v6660_v12  ;;  %5613 = vmatprep.mubr.msk.f32.mxu1 %vm239_vm1, %v7737_v45  ;;  %v7738_v12 = vld [vmem:[#allocation37_spill] sm:$0xff] }
 0x118   : > { %5839 = vmatprep.mubr.msk.f32.mxu0 %vm239_vm1, %v7710_v41 }
 0x11a   : > { %5614 = vmatmul.mubr.msk.f32.gmra.mrb[30].mxu1 %vm239_vm1, %v6962_v40 }
 0x11b   : > { %5840 = vmatmul.mubr.msk.f32.gmra.mrb[14].mxu0 %vm239_vm1, %v6675_v3  ;;  %5642 = vmatprep.mubr.msk.f32.mxu1 %vm239_vm1, %v6792_v5 }
 0x11c   : > { %5842 = vmatprep.mubr.msk.f32.mxu0 %vm239_vm1, %v6678_v62 }
 0x11e   : > { %5643 = vmatmul.mubr.msk.f32.vlgmr.msra.gmra.mrb[16].mxu1 %vm239_vm1, %v6808_v7 }
 0x11f   : > { %5843 = vmatmul.mubr.msk.f32.gmra.mrb[16].mxu0 %vm239_vm1, %v6693_v8  ;;  %5645 = vmatprep.mubr.msk.f32.mxu1 %vm239_vm1, %v6813_v14  ;;  %v5077_v14 = vld [vmem:[%s6325_s5 + $0x19a] sm:$0xff] }
 0x120   : > { %5845 = vmatprep.mubr.msk.f32.mxu0 %vm239_vm1, %v6698_v0 }
 0x122   : > { %5646 = vmatmul.mubr.msk.f32.gmra.mrb[18].mxu1 %vm239_vm1, %v6826_v44 }
 0x123   : > { %5846 = vmatmul.mubr.msk.f32.gmra.mrb[18].mxu0 %vm239_vm1, %v7711_v9  ;;  %5648 = vmatprep.mubr.msk.f32.mxu1 %vm239_vm1, %v6829_v18  ;;  %v7739_v18 = vld [vmem:[#allocation38_spill] sm:$0xff] }
 0x124   : > { %5848 = vmatprep.mubr.msk.f32.mxu0 %vm239_vm1, %v7712_v13 }
 0x126   : > { %5649 = vmatmul.mubr.msk.f32.gmra.mrb[20].mxu1 %vm239_vm1, %v6840_v20  ;;  %v5078_v20 = vld [vmem:[%s6325_s5 + $0x1a2] sm:$0xff]  ;;  %s6168_s5 = scalar_lea.vmem %s7554_s29, 4096 }
 0x127   : > { %5849 = vmatmul.mubr.msk.f32.gmra.mrb[20].mxu0 %vm239_vm1, %v7713_v15  ;;  %5651 = vmatprep.mubr.msk.f32.mxu1 %vm239_vm1, %v6843_v22  ;;  %p6169_p11 = scmp.ne.s32.totalorder %s7554_s29, %s6168_s5  ;;  %p6176_p1 = scmp.lt.s32.totalorder %s6174_s8, %s6168_s5 }
 0x128   : > { %5851 = vmatprep.mubr.msk.f32.mxu0 %vm239_vm1, %v7714_v17 }
 0x129   : > { %p6170_p12 = pnand %p6169_p11, %p6288_p5  ;;  %p6177_p2 = por %p6176_p1, %p6175_p0 }
 0x12a   : > { %5652 = vmatmul.mubr.msk.f32.gmra.mrb[22].mxu1 %vm239_vm1, %v6854_v24 }
 0x12b   : > { %5852 = vmatmul.mubr.msk.f32.gmra.mrb[22].mxu0 %vm239_vm1, %v7715_v19  ;;  %5654 = vmatprep.mubr.msk.f32.mxu1 %vm239_vm1, %v6857_v26  ;;  %p6171_p13 = pneg %p6170_p12 }
 0x12c   : > { %5854 = vmatprep.mubr.msk.f32.mxu0 %vm239_vm1, %v7716_v21 }
 0x12d   : > { %p6178_p3 = pnand %p6177_p2, %p6171_p13 }
 0x12e   : > { %5655 = vmatmul.mubr.msk.f32.gmra.mrb[24].mxu1 %vm239_vm1, %v6868_v28 }
 0x12f   : > { %5855 = vmatmul.mubr.msk.f32.gmra.mrb[24].mxu0 %vm239_vm1, %v7717_v23  ;;  %5657 = vmatprep.mubr.msk.f32.mxu1 %vm239_vm1, %v7727_v10 }
 0x130   : > { %5857 = vmatprep.mubr.msk.f32.mxu0 %vm239_vm1, %v6756_v6 }
 0x132   : > { %5658 = vmatmul.mubr.msk.f32.gmra.mrb[26].mxu1 %vm239_vm1, %v6882_v32 }
 0x133   : > { %5858 = vmatmul.mubr.msk.f32.gmra.mrb[26].mxu0 %vm239_vm1, %v7718_v25  ;;  %5660 = vmatprep.mubr.msk.f32.mxu1 %vm239_vm1, %v6885_v34 }
 0x134   : > { %5860 = vmatprep.mubr.msk.f32.mxu0 %vm239_vm1, %v7738_v12 }
 0x136   : > { %5661 = vmatmul.mubr.msk.f32.gmra.mrb[28].mxu1 %vm239_vm1, %v6896_v36 }
 0x137   : > { %5861 = vmatmul.mubr.msk.f32.gmra.mrb[28].mxu0 %vm239_vm1, %v7739_v18  ;;  %5663 = vmatprep.mubr.msk.f32.mxu1 %vm239_vm1, %v7089_v29 }
 0x138   : > { %5863 = vmatprep.mubr.msk.f32.mxu0 %vm239_vm1, %v5077_v14 }
 0x13a   : > { %5664 = vmatmul.mubr.msk.f32.gmra.mrb[30].mxu1 %vm239_vm1, %v7100_v1 }
 0x13b   : > { %5864 = vmatmul.mubr.msk.f32.gmra.mrb[30].mxu0 %vm239_vm1, %v5078_v20 }
 0x1b1   : > { %v5570_v22 = vpop.f32.mrb[0].mxu1 }
 0x1b2   : > { %v1769_v24 = vpop.f32.mrb[1].mxu1 }
 0x1b5   : > { %v5573_v26 = vpop.f32.mrb[2].mxu1 }
 0x1b6   : > { %v1779_v28 = vpop.f32.mrb[3].mxu1 }
 0x1b9   : > { %v5576_v32 = vpop.f32.mrb[4].mxu1 }
 0x1ba   : > { %v1789_v34 = vpop.f32.mrb[5].mxu1 }
 0x1bd   : > { %v5579_v36 = vpop.f32.mrb[6].mxu1 }
 0x1be   : > { %v1799_v46 = vpop.f32.mrb[7].mxu1 }
 0x1c1   : > { %v5582_v47 = vpop.f32.mrb[8].mxu1 }
 0x1c2   : > { %v1809_v48 = vpop.f32.mrb[9].mxu1 }
 0x1c5   : > { %v5585_v49 = vpop.f32.mrb[10].mxu1 }
 0x1c6   : > { %v1819_v50 = vpop.f32.mrb[11].mxu1 }
 0x1c9   : > { %v5588_v51 = vpop.f32.mrb[12].mxu1 }
 0x1ca   : > { %v1829_v52 = vpop.f32.mrb[13].mxu1 }
 0x1cd   : > { %v5591_v53 = vpop.f32.mrb[14].mxu1 }
 0x1ce   : > { %v1839_v54 = vpop.f32.mrb[15].mxu1 }
 0x1d2   : > { %v5820_v55 = vpop.f32.mrb[0].mxu0 }
 0x1d3   : > { %v7242_v56 = vadd.f32 %v5820_v55, %v5570_v22  ;;  %v4040_v57 = vpop.f32.mrb[1].mxu0 }
 0x1d4   : > { %v7244_v58 = vadd.f32 %v4040_v57, %v1769_v24 }
 0x1d6   : > { %v5823_v59 = vpop.f32.mrb[2].mxu0  ;;  %v4295_v63 = vadd.f32 %v7244_v58, %v7242_v56 }
 0x1d7   : > { %v7246_v61 = vadd.f32 %v5823_v59, %v5573_v26  ;;  %v4050_v62 = vpop.f32.mrb[3].mxu0 }
 0x1d8   : > { %v7250_v0 = vadd.f32 %v4050_v62, %v1779_v28 }
 0x1da   : > { %v4296_v2 = vadd.f32 %v7250_v0, %v4295_v63  ;;  %v5826_v3 = vpop.f32.mrb[4].mxu0 }
 0x1db   : > { %v7253_v4 = vadd.f32 %v5826_v3, %v5576_v32  ;;  %v4060_v8 = vpop.f32.mrb[5].mxu0 }
 0x1dc   : > { %v7255_v5 = vadd.f32 %v4060_v8, %v1789_v34  ;;  %v4297_v7 = vadd.f32 %v7246_v61, %v4296_v2 }
 0x1de   : > { %v4298_v6 = vadd.f32 %v7255_v5, %v4297_v7  ;;  %v5829_v44 = vpop.f32.mrb[6].mxu0 }
 0x1df   : > { %v7259_v30 = vadd.f32 %v5829_v44, %v5579_v36  ;;  %v4070_v39 = vpop.f32.mrb[7].mxu0 }
 0x1e0   : > { %v7261_v40 = vadd.f32 %v4070_v39, %v1799_v46  ;;  %v4299_v60 = vadd.f32 %v7253_v4, %v4298_v6 }
 0x1e2   : > { %v4300_v41 = vadd.f32 %v7261_v40, %v4299_v60  ;;  %v5832_v9 = vpop.f32.mrb[8].mxu0 }
 0x1e3   : > { %v7265_v13 = vadd.f32 %v5832_v9, %v5582_v47  ;;  %v4080_v15 = vpop.f32.mrb[9].mxu0 }
 0x1e4   : > { %v7267_v17 = vadd.f32 %v4080_v15, %v1809_v48  ;;  %v4301_v19 = vadd.f32 %v7259_v30, %v4300_v41 }
 0x1e6   : > { %v4302_v21 = vadd.f32 %v7267_v17, %v4301_v19  ;;  %v5835_v23 = vpop.f32.mrb[10].mxu0 }
 0x1e7   : > { %v7271_v25 = vadd.f32 %v5835_v23, %v5585_v49  ;;  %v4090_v10 = vpop.f32.mrb[11].mxu0 }
 0x1e8   : > { %v7273_v27 = vadd.f32 %v4090_v10, %v1819_v50  ;;  %v4303_v29 = vadd.f32 %v7265_v13, %v4302_v21 }
 0x1ea   : > { %v4304_v31 = vadd.f32 %v7273_v27, %v4303_v29  ;;  %v5838_v33 = vpop.f32.mrb[12].mxu0 }
 0x1eb   : > { %v7277_v1 = vadd.f32 %v5838_v33, %v5588_v51  ;;  %v4100_v35 = vpop.f32.mrb[13].mxu0 }
 0x1ec   : > { %v7279_v16 = vadd.f32 %v4100_v35, %v1829_v52  ;;  %v4305_v37 = vadd.f32 %v7271_v25, %v4304_v31 }
 0x1ee   : > { %v4306_v11 = vadd.f32 %v7279_v16, %v4305_v37  ;;  %v5841_v38 = vpop.f32.mrb[14].mxu0 }
 0x1ef   : > { %v7283_v42 = vadd.f32 %v5841_v38, %v5591_v53  ;;  %v4110_v43 = vpop.f32.mrb[15].mxu0 }
 0x1f0   : > { %v7285_v45 = vadd.f32 %v4110_v43, %v1839_v54  ;;  %v4307_v12 = vadd.f32 %v7277_v1, %v4306_v11 }
 0x1f1   : > { %v5644_v18 = vpop.f32.mrb[16].mxu1 }
 0x1f2   : > { %v4308_v14 = vadd.f32 %v7285_v45, %v4307_v12  ;;  %v5844_v20 = vpop.f32.mrb[16].mxu0  ;;  %v2303_v24 = vpop.f32.mrb[17].mxu1 }
 0x1f3   : > { %v7289_v22 = vadd.f32 %v5844_v20, %v5644_v18  ;;  %v4120_v26 = vpop.f32.mrb[17].mxu0 }
 0x1f4   : > { %v7291_v28 = vadd.f32 %v4120_v26, %v2303_v24  ;;  %v4309_v32 = vadd.f32 %v7283_v42, %v4308_v14 }
 0x1f5   : > { %v5647_v36 = vpop.f32.mrb[18].mxu1 }
 0x1f6   : > { %v4310_v34 = vadd.f32 %v7291_v28, %v4309_v32  ;;  %v5847_v46 = vpop.f32.mrb[18].mxu0  ;;  %v2313_v48 = vpop.f32.mrb[19].mxu1 }
 0x1f7   : > { %v7295_v47 = vadd.f32 %v5847_v46, %v5647_v36  ;;  %v4130_v49 = vpop.f32.mrb[19].mxu0 }
 0x1f8   : > { %v7297_v50 = vadd.f32 %v4130_v49, %v2313_v48  ;;  %v4311_v51 = vadd.f32 %v7289_v22, %v4310_v34 }
 0x1f9   : > { %v5650_v53 = vpop.f32.mrb[20].mxu1 }
 0x1fa   : > { %v4312_v52 = vadd.f32 %v7297_v50, %v4311_v51  ;;  %v5850_v54 = vpop.f32.mrb[20].mxu0  ;;  %v2323_v57 = vpop.f32.mrb[21].mxu1 }
 0x1fb   : > { %v7301_v55 = vadd.f32 %v5850_v54, %v5650_v53  ;;  %v4140_v59 = vpop.f32.mrb[21].mxu0 }
 0x1fc   : > { %v7303_v62 = vadd.f32 %v4140_v59, %v2323_v57  ;;  %v4313_v63 = vadd.f32 %v7295_v47, %v4312_v52 }
 0x1fd   : > { %v5653_v3 = vpop.f32.mrb[22].mxu1 }
 0x1fe   : > { %v4314_v2 = vadd.f32 %v7303_v62, %v4313_v63  ;;  %v5853_v8 = vpop.f32.mrb[22].mxu0  ;;  %v2333_v6 = vpop.f32.mrb[23].mxu1 }
 0x1ff   : > { %v5890_v7 = vadd.f32 %v5853_v8, %v5653_v3  ;;  %v4150_v44 = vpop.f32.mrb[23].mxu0 }
 0x200   : > { %v5891_v39 = vadd.f32 %v4150_v44, %v2333_v6  ;;  %v4315_v60 = vadd.f32 %v7301_v55, %v4314_v2 }
 0x201   : > { %v5656_v9 = vpop.f32.mrb[24].mxu1 }
 0x202   : > { %v4316_v41 = vadd.f32 %v5891_v39, %v4315_v60  ;;  %v5856_v15 = vpop.f32.mrb[24].mxu0  ;;  %v2343_v21 = vpop.f32.mrb[25].mxu1 }
 0x203   : > { %v5892_v19 = vadd.f32 %v5856_v15, %v5656_v9  ;;  %v4160_v23 = vpop.f32.mrb[25].mxu0 }
 0x204   : > { %v5893_v10 = vadd.f32 %v4160_v23, %v2343_v21  ;;  %v4317_v29 = vadd.f32 %v5890_v7, %v4316_v41 }
 0x205   : > { %v5659_v33 = vpop.f32.mrb[26].mxu1 }
 0x206   : > { %v4318_v31 = vadd.f32 %v5893_v10, %v4317_v29  ;;  %v5859_v35 = vpop.f32.mrb[26].mxu0  ;;  %v2353_v11 = vpop.f32.mrb[27].mxu1 }
 0x207   : > { %v5894_v37 = vadd.f32 %v5859_v35, %v5659_v33  ;;  %v4170_v38 = vpop.f32.mrb[27].mxu0 }
 0x208   : > { %v5895_v43 = vadd.f32 %v4170_v38, %v2353_v11  ;;  %v4319_v12 = vadd.f32 %v5892_v19, %v4318_v31 }
 0x209   : > { %v5662_v18 = vpop.f32.mrb[28].mxu1 }
 0x20a   : > { %v4320_v14 = vadd.f32 %v5895_v43, %v4319_v12  ;;  %v5862_v20 = vpop.f32.mrb[28].mxu0  ;;  %v2363_v26 = vpop.f32.mrb[29].mxu1 }
 0x20b   : > { %v5896_v24 = vadd.f32 %v5862_v20, %v5662_v18  ;;  %v4180_v32 = vpop.f32.mrb[29].mxu0 }
 0x20c   : > { %v5897_v34 = vadd.f32 %v4180_v32, %v2363_v26  ;;  %v4321_v36 = vadd.f32 %v5894_v37, %v4320_v14 }
 0x20d   : > { %v5665_v48 = vpop.f32.mrb[30].mxu1 }
 0x20e   : > { %v4322_v46 = vadd.f32 %v5897_v34, %v4321_v36  ;;  %v5865_v49 = vpop.f32.mrb[30].mxu0  ;;  %v2373_v52 = vpop.f32.mrb[31].mxu1 }
 0x20f   : > { %v5898_v51 = vadd.f32 %v5865_v49, %v5665_v48  ;;  %v4190_v53 = vpop.f32.mrb[31].mxu0 }
 0x210   : > { %v5899_v54 = vadd.f32 %v4190_v53, %v2373_v52  ;;  %v4323_v57 = vadd.f32 %v5896_v24, %v4322_v46 }
 0x212   : > { %v4324_v59 = vadd.f32 %v5899_v54, %v4323_v57 }
 0x214   : > { %v4325_v63 = vadd.f32 %v5898_v51, %v4324_v59 }
 0x216   : > { %v4326_v2 = vrot.slane %v4325_v63, 4 }
 0x218   : > { %v4327_v3 = vadd.f32 %v4326_v2, %v4325_v63 }
 0x21a   : > { %v4328_v8 = vrot.slane %v4327_v3, 2 }
 0x21c   : > { %v4329_v6 = vadd.f32 %v4328_v8, %v4327_v3 }
 0x21e   : > { %v4330_v44 = vrot.slane %v4329_v6, 1 }
 0x220   : > { %v4331_v60 = vadd.f32 %v4330_v44, %v4329_v6 }
 0x222   : > { %v4333_v41 = vmul.f32 0.00390625, %v4331_v60 }
 0x224   : > { %v7309_v9 = vsub.f32 %v7267_v17, %v4333_v41  ;;  %v7312_v15 = vsub.f32 %v7265_v13, %v4333_v41  ;;  %v7315_v21 = vsub.f32 %v7273_v27, %v4333_v41  ;;  %v7318_v23 = vsub.f32 %v7271_v25, %v4333_v41 }
 0x225   : > { %v7321_v29 = vsub.f32 %v7279_v16, %v4333_v41  ;;  %v7324_v31 = vsub.f32 %v7277_v1, %v4333_v41  ;;  %v7327_v33 = vsub.f32 %v7285_v45, %v4333_v41  ;;  %v7330_v17 = vsub.f32 %v7283_v42, %v4333_v41 }
 0x226   : > { %v7333_v13 = vsub.f32 %v7291_v28, %v4333_v41  ;;  %v7336_v27 = vsub.f32 %v7289_v22, %v4333_v41  ;;  %v7339_v25 = vsub.f32 %v7297_v50, %v4333_v41  ;;  %v7342_v16 = vsub.f32 %v7295_v47, %v4333_v41 }
 0x227   : > { %v7345_v1 = vsub.f32 %v7303_v62, %v4333_v41  ;;  %v7348_v45 = vsub.f32 %v7301_v55, %v4333_v41  ;;  %v7350_v42 = vsub.f32 %v5891_v39, %v4333_v41  ;;  %v7352_v35 = vsub.f32 %v5890_v7, %v4333_v41 }
 0x228   : > { %v7354_v28 = vsub.f32 %v5893_v10, %v4333_v41  ;;  %v7356_v22 = vsub.f32 %v5892_v19, %v4333_v41  ;;  %v7358_v11 = vsub.f32 %v5895_v43, %v4333_v41  ;;  %v7360_v50 = vsub.f32 %v5894_v37, %v4333_v41 }
 0x229   : > { %v7362_v47 = vsub.f32 %v5897_v34, %v4333_v41  ;;  %v7364_v38 = vsub.f32 %v5896_v24, %v4333_v41  ;;  %v7366_v62 = vsub.f32 %v5899_v54, %v4333_v41  ;;  %v7368_v55 = vsub.f32 %v5898_v51, %v4333_v41 }
 0x22a   : > { %v7371_v39 = vsub.f32 %v7244_v58, %v4333_v41  ;;  %v7374_v7 = vsub.f32 %v7242_v56, %v4333_v41  ;;  %v7377_v19 = vsub.f32 %v7250_v0, %v4333_v41  ;;  %v7384_v43 = vsub.f32 %v7246_v61, %v4333_v41 }
 0x22b   : > { %v7387_v12 = vsub.f32 %v7255_v5, %v4333_v41  ;;  %v7392_v14 = vsub.f32 %v7253_v4, %v4333_v41  ;;  %v7397_v20 = vsub.f32 %v7261_v40, %v4333_v41  ;;  %v7402_v5 = vsub.f32 %v7259_v30, %v4333_v41 }
 0x22c   : > { %v4366_v10 = vmul.f32 %v7371_v39, %v7371_v39  ;;  %v4367_v37 = vmul.f32 %v7374_v7, %v7374_v7  ;;  %v4368_v58 = vmul.f32 %v7377_v19, %v7377_v19  ;;  %v4369_v0 = vmul.f32 %v7384_v43, %v7384_v43 }
 0x22d   : > { %v4370_v61 = vmul.f32 %v7387_v12, %v7387_v12  ;;  %v4371_v26 = vmul.f32 %v7392_v14, %v7392_v14  ;;  %v4372_v4 = vmul.f32 %v7397_v20, %v7397_v20  ;;  %v4373_v36 = vmul.f32 %v7402_v5, %v7402_v5 }
 0x22e   : > { %v4398_v56 = vadd.f32 %v4367_v37, %v4366_v10  ;;  %v4374_v46 = vmul.f32 %v7309_v9, %v7309_v9  ;;  %v4375_v30 = vmul.f32 %v7312_v15, %v7312_v15  ;;  %v4376_v51 = vmul.f32 %v7315_v21, %v7315_v21 }
 0x22f   : > { %v4377_v53 = vmul.f32 %v7318_v23, %v7318_v23  ;;  %v4378_v57 = vmul.f32 %v7321_v29, %v7321_v29  ;;  %v4379_v63 = vmul.f32 %v7324_v31, %v7324_v31  ;;  %v4380_v3 = vmul.f32 %v7327_v33, %v7327_v33 }
 0x230   : > { %v4399_v18 = vadd.f32 %v4398_v56, %v4368_v58  ;;  %v4381_v6 = vmul.f32 %v7330_v17, %v7330_v17  ;;  %v4382_v60 = vmul.f32 %v7333_v13, %v7333_v13  ;;  %v4383_v10 = vmul.f32 %v7336_v27, %v7336_v27 }
 0x231   : > { %v4384_v58 = vmul.f32 %v7339_v25, %v7339_v25 }
 0x232   : > { %v4400_v24 = vadd.f32 %v4399_v18, %v4369_v0  ;;  %v4385_v0 = vmul.f32 %v7342_v16, %v7342_v16 }
 0x234   : > { %v4401_v32 = vadd.f32 %v4400_v24, %v4370_v61  ;;  %v4386_v61 = vmul.f32 %v7345_v1, %v7345_v1 }
 0x236   : > { %v4402_v34 = vadd.f32 %v4401_v32, %v4371_v26  ;;  %v4387_v26 = vmul.f32 %v7348_v45, %v7348_v45 }
 0x238   : > { %v4403_v40 = vadd.f32 %v4402_v34, %v4372_v4  ;;  %v4388_v4 = vmul.f32 %v7350_v42, %v7350_v42 }
 0x23a   : > { %v4404_v48 = vadd.f32 %v4403_v40, %v4373_v36  ;;  %v4389_v36 = vmul.f32 %v7352_v35, %v7352_v35 }
 0x23c   : > { %v4405_v49 = vadd.f32 %v4404_v48, %v4374_v46  ;;  %v4390_v46 = vmul.f32 %v7354_v28, %v7354_v28 }
 0x23e   : > { %v4406_v52 = vadd.f32 %v4405_v49, %v4375_v30  ;;  %v4391_v30 = vmul.f32 %v7356_v22, %v7356_v22 }
 0x240   : > { %v4407_v54 = vadd.f32 %v4406_v52, %v4376_v51  ;;  %v4392_v51 = vmul.f32 %v7358_v11, %v7358_v11 }
 0x242   : > { %v4408_v59 = vadd.f32 %v4407_v54, %v4377_v53  ;;  %v4393_v53 = vmul.f32 %v7360_v50, %v7360_v50 }
 0x244   : > { %v4409_v2 = vadd.f32 %v4408_v59, %v4378_v57  ;;  %v4394_v57 = vmul.f32 %v7362_v47, %v7362_v47 }
 0x246   : > { %v4410_v8 = vadd.f32 %v4409_v2, %v4379_v63  ;;  %v4395_v63 = vmul.f32 %v7364_v38, %v7364_v38 }
 0x248   : > { %v4411_v44 = vadd.f32 %v4410_v8, %v4380_v3  ;;  %v4396_v3 = vmul.f32 %v7366_v62, %v7366_v62 }
 0x24a   : > { %v4412_v41 = vadd.f32 %v4411_v44, %v4381_v6  ;;  %v4397_v6 = vmul.f32 %v7368_v55, %v7368_v55 }
 0x24c   : > { %v4413_v37 = vadd.f32 %v4412_v41, %v4382_v60 }
 0x24e   : > { %v4414_v56 = vadd.f32 %v4413_v37, %v4383_v10 }
 0x250   : > { %v4415_v18 = vadd.f32 %v4414_v56, %v4384_v58 }
 0x252   : > { %v4416_v24 = vadd.f32 %v4415_v18, %v4385_v0 }
 0x254   : > { %v4417_v32 = vadd.f32 %v4416_v24, %v4386_v61 }
 0x256   : > { %v4418_v34 = vadd.f32 %v4417_v32, %v4387_v26 }
 0x258   : > { %v4419_v40 = vadd.f32 %v4418_v34, %v4388_v4 }
 0x25a   : > { %v4420_v48 = vadd.f32 %v4419_v40, %v4389_v36 }
 0x25c   : > { %v4421_v49 = vadd.f32 %v4420_v48, %v4390_v46 }
 0x25e   : > { %v4422_v52 = vadd.f32 %v4421_v49, %v4391_v30 }
 0x260   : > { %v4423_v54 = vadd.f32 %v4422_v52, %v4392_v51 }
 0x262   : > { %v4424_v59 = vadd.f32 %v4423_v54, %v4393_v53 }
 0x264   : > { %v4425_v2 = vadd.f32 %v4424_v59, %v4394_v57 }
 0x266   : > { %v4426_v8 = vadd.f32 %v4425_v2, %v4395_v63 }
 0x268   : > { %v4427_v44 = vadd.f32 %v4426_v8, %v4396_v3 }
 0x26a   : > { %v4428_v60 = vadd.f32 %v4427_v44, %v4397_v6 }
 0x26c   : > { %v4429_v41 = vrot.slane %v4428_v60, 4 }
 0x26e   : > { %v4430_v10 = vadd.f32 %v4429_v41, %v4428_v60 }
 0x270   : > { %v4431_v37 = vrot.slane %v4430_v10, 2 }
 0x272   : > { %v4432_v58 = vadd.f32 %v4431_v37, %v4430_v10 }
 0x274   : > { %v4433_v56 = vrot.slane %v4432_v58, 1 }
 0x276   : > { %v4434_v0 = vadd.f32 %v4433_v56, %v4432_v58 }
 0x278   : > { %v4435_v18 = vmul.f32 0.00390625, %v4434_v0 }
 0x27a   : > { %v4436_v61 = vadd.f32 1e-05, %v4435_v18 }
 0x27c   : > { %6166 = vrsqrt.f32 %v4436_v61 }
 0x286   : > { %v6167_v24 = vpop.eup %6166 }
 0x287   : > { %v4468_v26 = vmul.f32 %v6167_v24, %v7366_v62  ;;  %v4438_v32 = vmul.f32 %v6167_v24, %v7371_v39  ;;  %v4439_v4 = vmul.f32 %v6167_v24, %v7374_v7  ;;  %v4440_v34 = vmul.f32 %v6167_v24, %v7377_v19 }
 0x288   : > { %v4441_v36 = vmul.f32 %v6167_v24, %v7384_v43  ;;  %v4442_v40 = vmul.f32 %v6167_v24, %v7387_v12  ;;  %v4443_v46 = vmul.f32 %v6167_v24, %v7392_v14  ;;  %v4444_v48 = vmul.f32 %v6167_v24, %v7397_v20 }
 0x289   : > { %v4500_v30 = vmax.f32 %v4468_v26, 0.0  ;;  %v4445_v49 = vmul.f32 %v6167_v24, %v7402_v5  ;;  %v4446_v51 = vmul.f32 %v6167_v24, %v7309_v9  ;;  %v4447_v62 = vmul.f32 %v6167_v24, %v7312_v15 }
 0x28a   : > { %v4448_v39 = vmul.f32 %v6167_v24, %v7315_v21  ;;  %v4449_v7 = vmul.f32 %v6167_v24, %v7318_v23  ;;  %v4450_v19 = vmul.f32 %v6167_v24, %v7321_v29  ;;  %v4451_v43 = vmul.f32 %v6167_v24, %v7324_v31 }
 0x28b   : > { %4532 = vst [vmem:[%s7476_s27 + $0xf0] sm:$0xff] %v4500_v30  ;;  %v4452_v12 = vmul.f32 %v6167_v24, %v7327_v33  ;;  %v4453_v14 = vmul.f32 %v6167_v24, %v7330_v17  ;;  %v4454_v9 = vmul.f32 %v6167_v24, %v7333_v13  ;;  %v4455_v15 = vmul.f32 %v6167_v24, %v7336_v27 }
 0x28c   : > { %v4456_v21 = vmul.f32 %v6167_v24, %v7339_v25  ;;  %v7485_v23 = vmul.f32 %v6167_v24, %v7342_v16  ;;  %v7488_v29 = vmul.f32 %v6167_v24, %v7345_v1  ;;  %v7491_v31 = vmul.f32 %v6167_v24, %v7348_v45 }
 0x28d   : > { %v7494_v20 = vmul.f32 %v6167_v24, %v7350_v42  ;;  %v7497_v33 = vmul.f32 %v6167_v24, %v7352_v35  ;;  %v7500_v17 = vmul.f32 %v6167_v24, %v7354_v28  ;;  %v7503_v13 = vmul.f32 %v6167_v24, %v7356_v22 }
 0x28e   : > { %v7506_v27 = vmul.f32 %v6167_v24, %v7358_v11  ;;  %v7509_v25 = vmul.f32 %v6167_v24, %v7360_v50  ;;  %v7512_v16 = vmul.f32 %v6167_v24, %v7362_v47  ;;  %v7515_v1 = vmul.f32 %v6167_v24, %v7364_v38 }
 0x28f   : > { %v7518_v45 = vmul.f32 %v6167_v24, %v7368_v55  ;;  %v4470_v42 = vmax.f32 %v4438_v32, 0.0  ;;  %v4471_v35 = vmax.f32 %v4439_v4, 0.0  ;;  %v4472_v28 = vmax.f32 %v4440_v34, 0.0 }
 0x290   : > { %v4473_v22 = vmax.f32 %v4441_v36, 0.0  ;;  %v4474_v11 = vmax.f32 %v4442_v40, 0.0  ;;  %v4475_v50 = vmax.f32 %v4443_v46, 0.0  ;;  %v4476_v5 = vmax.f32 %v4444_v48, 0.0 }
 0x291   : > { %v4477_v47 = vmax.f32 %v4445_v49, 0.0  ;;  %v4478_v52 = vmax.f32 %v4446_v51, 0.0  ;;  %v4479_v38 = vmax.f32 %v4447_v62, 0.0  ;;  %v4480_v53 = vmax.f32 %v4448_v39, 0.0  ;;  %4502 = vst [vmem:[%s7476_s27] sm:$0xff] %v4470_v42  ;;  %4503 = vst [vmem:[%s7476_s27 + $0x8] sm:$0xff] %v4471_v35 }
 0x292   : > { %4504 = vst [vmem:[%s7476_s27 + $0x10] sm:$0xff] %v4472_v28  ;;  %v4481_v55 = vmax.f32 %v4449_v7, 0.0  ;;  %v4482_v54 = vmax.f32 %v4450_v19, 0.0  ;;  %v4483_v57 = vmax.f32 %v4451_v43, 0.0  ;;  %v4484_v59 = vmax.f32 %v4452_v12, 0.0  ;;  %4505 = vst [vmem:[%s7476_s27 + $0x18] sm:$0xff] %v4473_v22 }
 0x293   : > { %4506 = vst [vmem:[%s7476_s27 + $0x20] sm:$0xff] %v4474_v11  ;;  %4507 = vst [vmem:[%s7476_s27 + $0x28] sm:$0xff] %v4475_v50  ;;  %v4485_v63 = vmax.f32 %v4453_v14, 0.0  ;;  %v4486_v2 = vmax.f32 %v4454_v9, 0.0  ;;  %v4487_v3 = vmax.f32 %v4455_v15, 0.0  ;;  %v4488_v8 = vmax.f32 %v4456_v21, 0.0 }
 0x294   : > { %4508 = vst [vmem:[%s7476_s27 + $0x30] sm:$0xff] %v4476_v5  ;;  %4509 = vst [vmem:[%s7476_s27 + $0x38] sm:$0xff] %v4477_v47  ;;  %v4489_v6 = vmax.f32 %v7485_v23, 0.0  ;;  %v4490_v44 = vmax.f32 %v7488_v29, 0.0  ;;  %v4491_v60 = vmax.f32 %v7491_v31, 0.0  ;;  %v4492_v41 = vmax.f32 %v7494_v20, 0.0 }
 0x295   : > { %4510 = vst [vmem:[%s7476_s27 + $0x40] sm:$0xff] %v4478_v52  ;;  %4511 = vst [vmem:[%s7476_s27 + $0x48] sm:$0xff] %v4479_v38  ;;  %v4493_v10 = vmax.f32 %v7497_v33, 0.0  ;;  %v4494_v37 = vmax.f32 %v7500_v17, 0.0  ;;  %v4495_v58 = vmax.f32 %v7503_v13, 0.0  ;;  %v4496_v56 = vmax.f32 %v7506_v27, 0.0 }
 0x296   : > { %4512 = vst [vmem:[%s7476_s27 + $0x50] sm:$0xff] %v4480_v53  ;;  %4513 = vst [vmem:[%s7476_s27 + $0x58] sm:$0xff] %v4481_v55  ;;  %v4497_v0 = vmax.f32 %v7509_v25, 0.0  ;;  %v4498_v18 = vmax.f32 %v7512_v16, 0.0  ;;  %v4499_v61 = vmax.f32 %v7515_v1, 0.0  ;;  %v4501_v24 = vmax.f32 %v7518_v45, 0.0 }
 0x297   : > { %4514 = vst [vmem:[%s7476_s27 + $0x60] sm:$0xff] %v4482_v54  ;;  %4515 = vst [vmem:[%s7476_s27 + $0x68] sm:$0xff] %v4483_v57 }
 0x298   : > { %4516 = vst [vmem:[%s7476_s27 + $0x70] sm:$0xff] %v4484_v59  ;;  %4517 = vst [vmem:[%s7476_s27 + $0x78] sm:$0xff] %v4485_v63 }
 0x299   : > { %4518 = vst [vmem:[%s7476_s27 + $0x80] sm:$0xff] %v4486_v2  ;;  %4519 = vst [vmem:[%s7476_s27 + $0x88] sm:$0xff] %v4487_v3 }
 0x29a   : > { %4520 = vst [vmem:[%s7476_s27 + $0x90] sm:$0xff] %v4488_v8  ;;  %4521 = vst [vmem:[%s7476_s27 + $0x98] sm:$0xff] %v4489_v6 }
 0x29b   : > { %4522 = vst [vmem:[%s7476_s27 + $0xa0] sm:$0xff] %v4490_v44  ;;  %4523 = vst [vmem:[%s7476_s27 + $0xa8] sm:$0xff] %v4491_v60 }
 0x29c   : > { %4524 = vst [vmem:[%s7476_s27 + $0xb0] sm:$0xff] %v4492_v41  ;;  %4525 = vst [vmem:[%s7476_s27 + $0xb8] sm:$0xff] %v4493_v10 }
 0x29d   : > { %4526 = vst [vmem:[%s7476_s27 + $0xc0] sm:$0xff] %v4494_v37  ;;  %4527 = vst [vmem:[%s7476_s27 + $0xc8] sm:$0xff] %v4495_v58 }
 0x29e   : > { %4528 = vst [vmem:[%s7476_s27 + $0xd0] sm:$0xff] %v4496_v56  ;;  %4529 = vst [vmem:[%s7476_s27 + $0xd8] sm:$0xff] %v4497_v0 }
 0x29f   : > { %4530 = vst [vmem:[%s7476_s27 + $0xe0] sm:$0xff] %v4498_v18  ;;  %4531 = vst [vmem:[%s7476_s27 + $0xe8] sm:$0xff] %v4499_v61 }
 0x2a0   : > { %4533 = vst [vmem:[%s7476_s27 + $0xf8] sm:$0xff] %v4501_v24 }
 0x2a1   : > { %6181 = shalt.err (!%p6178_p3)
}
 0x2a2   : > { %s6182_s14 = scalar_lea.hbm %s7552_s3, 4096  ;;  %s6186_s21 = scalar_lea.hbm %s7617_s2, 8192 }
 0x2a3   : > { %p6183_p4 = scmp.ne.s32.totalorder %s7552_s3, %s6182_s14  ;;  %p6187_p9 = scmp.lt.u32.totalorder %s7552_s3, %s7617_s2 }
 0x2a4   : > { %p6188_p10 = scmp.lt.u32.totalorder %s6186_s21, %s6182_s14  ;;  %p6190_p12 = scmp.lt.u32.totalorder %s6182_s14, %s7552_s3 }
 0x2a5   : > { %p6184_p7 = pnand %p6183_p4, %p6288_p5 }
 0x2a6   : > { %p6189_p11 = por %p6188_p10, %p6187_p9 }
 0x2a7   : > { %p6185_p8 = pneg %p6184_p7 }
 0x2a8   : > { %p6191_p13 = por %p6190_p12, %p6189_p11 }
 0x2aa   : > { %p6192_p0 = pnand %p6191_p13, %p6185_p8 }
 0x2ac   : > { %6195 = shalt.err (!%p6192_p0)
}
 0x2ad   : > { %s6233_s24 = smov 128   ;;  %s6234_s25 = smov 8  }
 0x2ae   : > { %6125 = dma.vmem_to_hbm [thread:$0]  (%p6288_p5), %s7554_s29, 4096, %s7552_s3, %s7574_s4, %s6233_s24, %s6233_s24, %s6234_s25  }
 0x2af PF: > { %p6131_p1 = scmp.ge.s32.totalorder %s6230_s12, 2  ;;  %s4563_s26 = sand.u32 1, %s6218_s9  }
 0x2b0   : > { %s4564_s27 = scalar_lea.sflag [#allocation4], %s4563_s26 }
 0x2b1   : > { %p6128_p2 = pnand %p6131_p1, %p6292_p6 }
 0x2b3   : > { %6213 = dma.done.wait (!%p6128_p2), %s4564_s27, 4096  }
 0x2b4   : > { %6215 = vsyncadd (!%p6128_p2), %s4564_s27, 4294963200  ;;  %p12_p3 = scmp.ge.s32.totalorder %s6275_s15, 4   ;;  %s7740_s9 = smov %s6222_s10 }
 0x2b5   : > { %s7741_s10 = smov %s6226_s11  ;;  %s7742_s11 = smov %s6286_s18 }
 0x2b6   : > { %s7743_s12 = smov %s6275_s15  ;;  %14 = sbr.rel (!%p12_p3) target bundleno = 3 (0x3), region = 73 }
 0x2bd   :  { %4569 = vsyncpa [#allocation4], 1 }
 0x2be   :  { %4571 = vsyncpa [#allocation4 + $0x1], 1 }

</bundles_post_ra>
